<compile_context>
chip_gen: v5e
topology: v5e:2x2
jax: 0.10.0
libtpu: 0.0.40
codegen_flags: <defaults>
</compile_context>

<pallas_src>
import math
from functools import partial

import jax
import jax.numpy as jnp
from jax.experimental import pallas as pl
from jax.experimental.pallas import tpu as pltpu


def _make_kernel(num_heads: int, compute_dtype):
    H = num_heads
    cdt = compute_dtype

    def kernel(tgt_ref, mem_ref, qpos_ref, pos_ref,
               a1_qkw, a1_qkb, a1_vw, a1_vb, a1_ow, a1_ob,
               a2_qw, a2_qb, a2_kw, a2_kb, a2_vw, a2_vb, a2_ow, a2_ob,
               l1_w, l1_b, l2_w, l2_b,
               n1_g, n1_b, n2_g, n2_b, n3_g, n3_b,
               out_ref):
        Nb, T, E = tgt_ref.shape
        S = mem_ref.shape[1]
        Dh = E // H
        inv_e = 1.0 / E

        # Flatten (Nb, L, E) -> (Nb*L, E): leading-dim merge, layout-free.
        tgt = tgt_ref[...].reshape(Nb * T, E)
        qpos = qpos_ref[...].reshape(Nb * T, E)
        mem = mem_ref[...].reshape(Nb * S, E)
        pos = pos_ref[...].reshape(Nb * S, E)

        def matmul(a, w_ref, b_ref=None):
            # bf16 MXU operands, f32 accumulation; bias add stays f32.
            r = jnp.dot(a.astype(cdt), w_ref[...],
                        preferred_element_type=jnp.float32)
            return r if b_ref is None else r + b_ref[0]

        def layer_norm(x, g_ref, b_ref):
            mu = jnp.sum(x, axis=-1, keepdims=True) * inv_e
            xc = x - mu
            var = jnp.sum(xc * xc, axis=-1, keepdims=True) * inv_e
            return xc * jax.lax.rsqrt(var + 1e-5) * g_ref[0] + b_ref[0]

        def attention(q, k, v, ow_ref, ob_ref):
            # q: (Nb*Tq, E); k, v: (Nb*Sk, E).  1/sqrt(Dh) already folded into q.
            Tq = q.shape[0] // Nb
            Sk = k.shape[0] // Nb
            q3 = q.reshape(Nb, Tq, E).astype(cdt)
            k3 = k.reshape(Nb, Sk, E).astype(cdt)
            v3 = v.reshape(Nb, Sk, E).astype(cdt)
            acc = jnp.zeros((Nb * Tq, E), jnp.float32)
            for h in range(H):                      # static loop over heads
                sl = slice(h * Dh, (h + 1) * Dh)
                # Batched (over Nb) NT matmul: no explicit transpose.
                s = jnp.einsum('btd,bsd->bts', q3[:, :, sl], k3[:, :, sl],
                               preferred_element_type=jnp.float32)
                s = s - jnp.max(s, axis=-1, keepdims=True)
                p = jnp.exp(s)
                p = p * pl.reciprocal(jnp.sum(p, axis=-1, keepdims=True),
                                      approx=True)
                oh = jnp.einsum('bts,bsd->btd', p.astype(cdt), v3[:, :, sl],
                                preferred_element_type=jnp.float32)
                # Fold concat + out_proj: per-head partial projection with the
                # pre-split (H, Dh, E) weight -> plain leading-axis ref load.
                acc = acc + jnp.dot(oh.reshape(Nb * Tq, Dh).astype(cdt),
                                    ow_ref[h],
                                    preferred_element_type=jnp.float32)
            return acc + ob_ref[0]

        # TODO(synk): attn_mask / key_padding_mask and training-time dropout are
        #             not implemented (forward uses None masks / eval semantics).

        # --- self attention (fused Q+K projection: shared q == k input) ---
        xq = tgt + qpos
        qk = matmul(xq, a1_qkw, a1_qkb)            # (Nb*T, 2E); Q half pre-scaled
        v1 = matmul(tgt, a1_vw, a1_vb)
        sa = attention(qk[:, :E], qk[:, E:], v1, a1_ow, a1_ob)
        x = layer_norm(tgt + sa, n1_g, n1_b)

        # --- cross attention ---
        q2 = matmul(x + qpos, a2_qw, a2_qb)        # scale folded into weights
        k2 = matmul(mem + pos, a2_kw, a2_kb)
        v2 = matmul(mem, a2_vw, a2_vb)
        ca = attention(q2, k2, v2, a2_ow, a2_ob)
        x = layer_norm(x + ca, n2_g, n2_b)

        # --- feed forward ---
        h1 = jnp.maximum(matmul(x, l1_w, l1_b), 0.0)
        h2 = matmul(h1, l2_w, l2_b)
        x = layer_norm(x + h2, n3_g, n3_b)

        out_ref[...] = x.astype(out_ref.dtype)

    return kernel


def _prepare_weights(p, num_heads, compute_dtype):
    """Host-side weight re-layout: transpose everything to x @ W form, fold the
    attention scale into Q, fuse self-attn Q/K, split out-proj per head, and cast
    matmul weights to the MXU compute dtype (biases / LN params stay f32)."""
    E = p["a1_out_w"].shape[0]
    F = p["l1_w"].shape[0]
    H = num_heads
    Dh = E // H
    scale = 1.0 / math.sqrt(Dh)
    f32 = jnp.float32

    def w(x):
        return x.astype(compute_dtype)

    a1_in_w, a1_in_b = p["a1_in_w"], p["a1_in_b"]
    a2_in_w, a2_in_b = p["a2_in_w"], p["a2_in_b"]

    qk_w = jnp.concatenate([a1_in_w[:E].T * scale, a1_in_w[E:2 * E].T], axis=1)
    qk_b = jnp.concatenate([a1_in_b[0] * scale, a1_in_b[1]])[None, :]

    return [
        # self attention
        w(qk_w), qk_b.astype(f32),
        w(a1_in_w[2 * E:].T), a1_in_b[2][None].astype(f32),
        w(p["a1_out_w"].T.reshape(H, Dh, E)), p["a1_out_b"].astype(f32),
        # cross attention
        w(a2_in_w[:E].T * scale), (a2_in_b[0] * scale)[None].astype(f32),
        w(a2_in_w[E:2 * E].T), a2_in_b[1][None].astype(f32),
        w(a2_in_w[2 * E:].T), a2_in_b[2][None].astype(f32),
        w(p["a2_out_w"].T.reshape(H, Dh, E)), p["a2_out_b"].astype(f32),
        # FFN
        w(p["l1_w"].T), p["l1_b"].astype(f32),
        w(p["l2_w"].T), p["l2_b"].astype(f32),
        # LayerNorms
        p["n1_g"].astype(f32), p["n1_b"].astype(f32),
        p["n2_g"].astype(f32), p["n2_b"].astype(f32),
        p["n3_g"].astype(f32), p["n3_b"].astype(f32),
    ]


def transformer_decoder_layer(tgt, memory, params, *, pos, query_pos, num_heads,
                              compute_dtype=jnp.bfloat16, batch_block=None):
    # tgt: (T, N, E), memory: (S, N, E), query_pos: (T, N, E), pos: (S, N, E)
    T, N, E = tgt.shape
    S = memory.shape[0]
    assert E % num_heads == 0

    if batch_block is None:
        # Aim for >= 128 matmul rows per step; cap by a small activation VMEM
        # budget so the same tiling also fits v7x's smaller (64 MiB) VMEM.
        rows_target = -(-128 // T)                                   # ceil(128/T)
        vmem_cap = max(1, (4 << 20) // (4 * E * 2 * (T + S)))
        cap = max(1, min(N, rows_target, vmem_cap))
        batch_block = max(d for d in range(1, cap + 1) if N % d == 0)
    Nb = batch_block
    assert N % Nb == 0
    # NOTE: on v7x keep N // Nb even when possible so both TensorCores get work.

    tgt_b = jnp.transpose(tgt, (1, 0, 2))        # (N, T, E)
    mem_b = jnp.transpose(memory, (1, 0, 2))     # (N, S, E)
    qpos_b = jnp.transpose(query_pos, (1, 0, 2))
    pos_b = jnp.transpose(pos, (1, 0, 2))

    weights = _prepare_weights(params, num_heads, compute_dtype)

    act_specs = [
        pl.BlockSpec((Nb, T, E), lambda b: (b, 0, 0)),
        pl.BlockSpec((Nb, S, E), lambda b: (b, 0, 0)),
        pl.BlockSpec((Nb, T, E), lambda b: (b, 0, 0)),
        pl.BlockSpec((Nb, S, E), lambda b: (b, 0, 0)),
    ]
    # Grid-invariant weight blocks (constant index_map -> fetched once).
    w_specs = [pl.BlockSpec(tuple(wt.shape), lambda b, _n=wt.ndim: (0,) * _n)
               for wt in weights]

    out = pl.pallas_call(
        _make_kernel(num_heads, compute_dtype),
        out_shape=jax.ShapeDtypeStruct((N * T, E), jnp.float32),
        grid_spec=pltpu.PrefetchScalarGridSpec(
            num_scalar_prefetch=0,
            grid=(N // Nb,),
            in_specs=act_specs + w_specs,
            out_specs=pl.BlockSpec((Nb * T, E), lambda b: (b, 0)),
        ),
        compiler_params=pltpu.CompilerParams(
            dimension_semantics=("parallel",)),
    )(tgt_b, mem_b, qpos_b, pos_b, *weights)

    return jnp.transpose(out.reshape(N, T, E), (1, 0, 2))   # back to (T, N, E)


def init_params(key, E, F):
    ks = jax.random.split(key, 12)
    s = 0.1
    u = lambda k, shape: jax.random.uniform(k, shape, jnp.float32, -s, s)
    return {
        # attention 1 (self) — PyTorch nn.MultiheadAttention layout
        "a1_in_w": u(ks[0], (3 * E, E)), "a1_in_b": u(ks[1], (3, E)),
        "a1_out_w": u(ks[2], (E, E)),    "a1_out_b": u(ks[3], (1, E)),
        # attention 2 (cross)
        "a2_in_w": u(ks[4], (3 * E, E)), "a2_in_b": u(ks[5], (3, E)),
        "a2_out_w": u(ks[6], (E, E)),    "a2_out_b": u(ks[7], (1, E)),
        # FFN (PyTorch nn.Linear layout)
        "l1_w": u(ks[8], (F, E)),  "l1_b": u(ks[9], (1, F)),
        "l2_w": u(ks[10], (E, F)), "l2_b": u(ks[11], (1, E)),
        # LayerNorms (PyTorch default init)
        "n1_g": jnp.ones((1, E), jnp.float32), "n1_b": jnp.zeros((1, E), jnp.float32),
        "n2_g": jnp.ones((1, E), jnp.float32), "n2_b": jnp.zeros((1, E), jnp.float32),
        "n3_g": jnp.ones((1, E), jnp.float32), "n3_b": jnp.zeros((1, E), jnp.float32),
    }


def _ref_layer_single(tgt, mem, qpos, pos, p, H):
    # pure-JAX f32 reference for one batch element (PyTorch eval semantics)
    E = tgt.shape[-1]
    Dh = E // H

    def mha(q_in, k_in, v_in, in_w, in_b, out_w, out_b):
        q = q_in @ in_w[:E].T + in_b[0]
        k = k_in @ in_w[E:2 * E].T + in_b[1]
        v = v_in @ in_w[2 * E:].T + in_b[2]
        qh = q.reshape(-1, H, Dh).transpose(1, 0, 2)
        kh = k.reshape(-1, H, Dh).transpose(1, 0, 2)
        vh = v.reshape(-1, H, Dh).transpose(1, 0, 2)
        s = jnp.einsum('htd,hsd->hts', qh, kh) / math.sqrt(Dh)
        a = jax.nn.softmax(s, axis=-1)
        o = jnp.einsum('hts,hsd->htd', a, vh).transpose(1, 0, 2).reshape(-1, E)
        return o @ out_w.T + out_b[0]

    def ln(x, g, b):
        mu = x.mean(-1, keepdims=True)
        var = ((x - mu) ** 2).mean(-1, keepdims=True)
        return (x - mu) / jnp.sqrt(var + 1e-5) * g[0] + b[0]

    qk = tgt + qpos
    x = ln(tgt + mha(qk, qk, tgt, p["a1_in_w"], p["a1_in_b"],
                     p["a1_out_w"], p["a1_out_b"]), p["n1_g"], p["n1_b"])
    x2 = mha(x + qpos, mem + pos, mem, p["a2_in_w"], p["a2_in_b"],
             p["a2_out_w"], p["a2_out_b"])
    x = ln(x + x2, p["n2_g"], p["n2_b"])
    h = jax.nn.relu(x @ p["l1_w"].T + p["l1_b"][0])
    x = ln(x + h @ p["l2_w"].T + p["l2_b"][0], p["n3_g"], p["n3_b"])
    return x


if __name__ == "__main__":
    E, H, F = 32, 4, 64          # hiddenDims, numHead, dimFeedForward
    T, S, N = 8, 16, 2           # tgt seq, memory seq, batch

    key = jax.random.PRNGKey(0)
    k1, k2, k3, k4, kp = jax.random.split(key, 5)
    tgt = jax.random.normal(k1, (T, N, E), jnp.float32)
    memory = jax.random.normal(k2, (S, N, E), jnp.float32)
    query_pos = jax.random.normal(k3, (T, N, E), jnp.float32)
    pos = jax.random.normal(k4, (S, N, E), jnp.float32)
    params = init_params(kp, E, F)

    out = transformer_decoder_layer(tgt, memory, params,
                                    pos=pos, query_pos=query_pos, num_heads=H)
    out = jax.block_until_ready(out)

    # verify against a pure-JAX f32 reference (kernel uses bf16 MXU operands,
    # so the tolerance is loosened accordingly)
    ref_fn = jax.vmap(partial(_ref_layer_single, H=H),
                      in_axes=(0, 0, 0, 0, None))
    ref = ref_fn(jnp.transpose(tgt, (1, 0, 2)),
                 jnp.transpose(memory, (1, 0, 2)),
                 jnp.transpose(query_pos, (1, 0, 2)),
                 jnp.transpose(pos, (1, 0, 2)),
                 params)
    ref = jnp.transpose(ref, (1, 0, 2))
    assert out.shape == (T, N, E)
    assert jnp.allclose(out, ref, atol=5e-2, rtol=5e-2), \
        f"mismatch vs reference, max|d|={float(jnp.max(jnp.abs(out - ref))):.3e}"

    print("KERNEL_OK")
</pallas_src>

<mosaic_0001>
module attributes {stable_mosaic.version = 11 : i64} {
  func.func @kernel(%arg0: i32, %arg1: memref<2x8x32xf32, #tpu.memory_space<vmem>>, %arg2: memref<2x16x32xf32, #tpu.memory_space<vmem>>, %arg3: memref<2x8x32xf32, #tpu.memory_space<vmem>>, %arg4: memref<2x16x32xf32, #tpu.memory_space<vmem>>, %arg5: memref<32x64xbf16, #tpu.memory_space<vmem>>, %arg6: memref<1x64xf32, #tpu.memory_space<vmem>>, %arg7: memref<32x32xbf16, #tpu.memory_space<vmem>>, %arg8: memref<1x32xf32, #tpu.memory_space<vmem>>, %arg9: memref<4x8x32xbf16, #tpu.memory_space<vmem>>, %arg10: memref<1x32xf32, #tpu.memory_space<vmem>>, %arg11: memref<32x32xbf16, #tpu.memory_space<vmem>>, %arg12: memref<1x32xf32, #tpu.memory_space<vmem>>, %arg13: memref<32x32xbf16, #tpu.memory_space<vmem>>, %arg14: memref<1x32xf32, #tpu.memory_space<vmem>>, %arg15: memref<32x32xbf16, #tpu.memory_space<vmem>>, %arg16: memref<1x32xf32, #tpu.memory_space<vmem>>, %arg17: memref<4x8x32xbf16, #tpu.memory_space<vmem>>, %arg18: memref<1x32xf32, #tpu.memory_space<vmem>>, %arg19: memref<32x64xbf16, #tpu.memory_space<vmem>>, %arg20: memref<1x64xf32, #tpu.memory_space<vmem>>, %arg21: memref<64x32xbf16, #tpu.memory_space<vmem>>, %arg22: memref<1x32xf32, #tpu.memory_space<vmem>>, %arg23: memref<1x32xf32, #tpu.memory_space<vmem>>, %arg24: memref<1x32xf32, #tpu.memory_space<vmem>>, %arg25: memref<1x32xf32, #tpu.memory_space<vmem>>, %arg26: memref<1x32xf32, #tpu.memory_space<vmem>>, %arg27: memref<1x32xf32, #tpu.memory_space<vmem>>, %arg28: memref<1x32xf32, #tpu.memory_space<vmem>>, %arg29: memref<16x32xf32, #tpu.memory_space<vmem>>) attributes {dimension_semantics = [#tpu.dimension_semantics<parallel>], iteration_bounds = array<i64: 1>, scalar_prefetch = 0 : i64, scratch_operands = 0 : i64, tpu.core_type = #tpu.core_type<tc>, window_params = [{transform_indices = @transform_0, window_bounds = array<i64: 2, 8, 32>}, {transform_indices = @transform_1, window_bounds = array<i64: 2, 16, 32>}, {transform_indices = @transform_2, window_bounds = array<i64: 2, 8, 32>}, {transform_indices = @transform_3, window_bounds = array<i64: 2, 16, 32>}, {pipeline_mode = #tpu.pipeline_mode<synchronous>, transform_indices = @transform_4, window_bounds = array<i64: 32, 64>}, {pipeline_mode = #tpu.pipeline_mode<synchronous>, transform_indices = @transform_5, window_bounds = array<i64: 1, 64>}, {pipeline_mode = #tpu.pipeline_mode<synchronous>, transform_indices = @transform_6, window_bounds = array<i64: 32, 32>}, {pipeline_mode = #tpu.pipeline_mode<synchronous>, transform_indices = @transform_7, window_bounds = array<i64: 1, 32>}, {pipeline_mode = #tpu.pipeline_mode<synchronous>, transform_indices = @transform_8, window_bounds = array<i64: 4, 8, 32>}, {pipeline_mode = #tpu.pipeline_mode<synchronous>, transform_indices = @transform_9, window_bounds = array<i64: 1, 32>}, {pipeline_mode = #tpu.pipeline_mode<synchronous>, transform_indices = @transform_10, window_bounds = array<i64: 32, 32>}, {pipeline_mode = #tpu.pipeline_mode<synchronous>, transform_indices = @transform_11, window_bounds = array<i64: 1, 32>}, {pipeline_mode = #tpu.pipeline_mode<synchronous>, transform_indices = @transform_12, window_bounds = array<i64: 32, 32>}, {pipeline_mode = #tpu.pipeline_mode<synchronous>, transform_indices = @transform_13, window_bounds = array<i64: 1, 32>}, {pipeline_mode = #tpu.pipeline_mode<synchronous>, transform_indices = @transform_14, window_bounds = array<i64: 32, 32>}, {pipeline_mode = #tpu.pipeline_mode<synchronous>, transform_indices = @transform_15, window_bounds = array<i64: 1, 32>}, {pipeline_mode = #tpu.pipeline_mode<synchronous>, transform_indices = @transform_16, window_bounds = array<i64: 4, 8, 32>}, {pipeline_mode = #tpu.pipeline_mode<synchronous>, transform_indices = @transform_17, window_bounds = array<i64: 1, 32>}, {pipeline_mode = #tpu.pipeline_mode<synchronous>, transform_indices = @transform_18, window_bounds = array<i64: 32, 64>}, {pipeline_mode = #tpu.pipeline_mode<synchronous>, transform_indices = @transform_19, window_bounds = array<i64: 1, 64>}, {pipeline_mode = #tpu.pipeline_mode<synchronous>, transform_indices = @transform_20, window_bounds = array<i64: 64, 32>}, {pipeline_mode = #tpu.pipeline_mode<synchronous>, transform_indices = @transform_21, window_bounds = array<i64: 1, 32>}, {pipeline_mode = #tpu.pipeline_mode<synchronous>, transform_indices = @transform_22, window_bounds = array<i64: 1, 32>}, {pipeline_mode = #tpu.pipeline_mode<synchronous>, transform_indices = @transform_23, window_bounds = array<i64: 1, 32>}, {pipeline_mode = #tpu.pipeline_mode<synchronous>, transform_indices = @transform_24, window_bounds = array<i64: 1, 32>}, {pipeline_mode = #tpu.pipeline_mode<synchronous>, transform_indices = @transform_25, window_bounds = array<i64: 1, 32>}, {pipeline_mode = #tpu.pipeline_mode<synchronous>, transform_indices = @transform_26, window_bounds = array<i64: 1, 32>}, {pipeline_mode = #tpu.pipeline_mode<synchronous>, transform_indices = @transform_27, window_bounds = array<i64: 1, 32>}, {transform_indices = @transform_28, window_bounds = array<i64: 16, 32>}]} {
    %c0 = arith.constant 0 : index
    %c0_0 = arith.constant 0 : index
    %c0_1 = arith.constant 0 : index
    %0 = vector.load %arg1[%c0, %c0_0, %c0_1] : memref<2x8x32xf32, #tpu.memory_space<vmem>>, vector<2x8x32xf32>
    %1 = vector.shape_cast %0 : vector<2x8x32xf32> to vector<16x32xf32>
    %c0_2 = arith.constant 0 : index
    %c0_3 = arith.constant 0 : index
    %c0_4 = arith.constant 0 : index
    %2 = vector.load %arg3[%c0_2, %c0_3, %c0_4] : memref<2x8x32xf32, #tpu.memory_space<vmem>>, vector<2x8x32xf32>
    %3 = vector.shape_cast %2 : vector<2x8x32xf32> to vector<16x32xf32>
    %c0_5 = arith.constant 0 : index
    %c0_6 = arith.constant 0 : index
    %c0_7 = arith.constant 0 : index
    %4 = vector.load %arg2[%c0_5, %c0_6, %c0_7] : memref<2x16x32xf32, #tpu.memory_space<vmem>>, vector<2x16x32xf32>
    %5 = vector.shape_cast %4 : vector<2x16x32xf32> to vector<32x32xf32>
    %c0_8 = arith.constant 0 : index
    %c0_9 = arith.constant 0 : index
    %c0_10 = arith.constant 0 : index
    %6 = vector.load %arg4[%c0_8, %c0_9, %c0_10] : memref<2x16x32xf32, #tpu.memory_space<vmem>>, vector<2x16x32xf32>
    %7 = vector.shape_cast %6 : vector<2x16x32xf32> to vector<32x32xf32>
    %8 = arith.addf %1, %3 : vector<16x32xf32>
    %9 = arith.truncf %8 : vector<16x32xf32> to vector<16x32xbf16>
    %c0_11 = arith.constant 0 : index
    %c0_12 = arith.constant 0 : index
    %10 = vector.load %arg5[%c0_11, %c0_12] : memref<32x64xbf16, #tpu.memory_space<vmem>>, vector<32x64xbf16>
    %cst = arith.constant dense<0.000000e+00> : vector<16x64xf32>
    %11 = tpu.matmul %9, %10, %cst {dimension_numbers = #tpu.dot_dimension_numbers<[1], [0], [0], [1], [0, 0, 1, 1], [], []>} : vector<16x32xbf16>, vector<32x64xbf16>, vector<16x64xf32> -> vector<16x64xf32>
    %c0_13 = arith.constant 0 : index
    %c0_14 = arith.constant 0 : index
    %12 = vector.load %arg6[%c0_13, %c0_14] : memref<1x64xf32, #tpu.memory_space<vmem>>, vector<1x64xf32>
    %13 = vector.shape_cast %12 : vector<1x64xf32> to vector<64xf32>
    %14 = vector.shape_cast %13 : vector<64xf32> to vector<1x64xf32>
    %15 = vector.broadcast %14 : vector<1x64xf32> to vector<16x64xf32>
    %16 = arith.addf %11, %15 : vector<16x64xf32>
    %17 = arith.truncf %1 : vector<16x32xf32> to vector<16x32xbf16>
    %c0_15 = arith.constant 0 : index
    %c0_16 = arith.constant 0 : index
    %18 = vector.load %arg7[%c0_15, %c0_16] : memref<32x32xbf16, #tpu.memory_space<vmem>>, vector<32x32xbf16>
    %cst_17 = arith.constant dense<0.000000e+00> : vector<16x32xf32>
    %19 = tpu.matmul %17, %18, %cst_17 {dimension_numbers = #tpu.dot_dimension_numbers<[1], [0], [0], [1], [0, 0, 1, 1], [], []>} : vector<16x32xbf16>, vector<32x32xbf16>, vector<16x32xf32> -> vector<16x32xf32>
    %c0_18 = arith.constant 0 : index
    %c0_19 = arith.constant 0 : index
    %20 = vector.load %arg8[%c0_18, %c0_19] : memref<1x32xf32, #tpu.memory_space<vmem>>, vector<1x32xf32>
    %21 = vector.shape_cast %20 : vector<1x32xf32> to vector<32xf32>
    %22 = vector.shape_cast %21 : vector<32xf32> to vector<1x32xf32>
    %23 = vector.broadcast %22 : vector<1x32xf32> to vector<16x32xf32>
    %24 = arith.addf %19, %23 : vector<16x32xf32>
    %25 = vector.extract_strided_slice %16 {offsets = [0, 0], sizes = [16, 32], strides = [1, 1]} : vector<16x64xf32> to vector<16x32xf32>
    %26 = vector.extract_strided_slice %16 {offsets = [0, 32], sizes = [16, 32], strides = [1, 1]} : vector<16x64xf32> to vector<16x32xf32>
    %27 = vector.shape_cast %25 : vector<16x32xf32> to vector<2x8x32xf32>
    %28 = arith.truncf %27 : vector<2x8x32xf32> to vector<2x8x32xbf16>
    %29 = vector.shape_cast %26 : vector<16x32xf32> to vector<2x8x32xf32>
    %30 = arith.truncf %29 : vector<2x8x32xf32> to vector<2x8x32xbf16>
    %31 = vector.shape_cast %24 : vector<16x32xf32> to vector<2x8x32xf32>
    %32 = arith.truncf %31 : vector<2x8x32xf32> to vector<2x8x32xbf16>
    %cst_20 = arith.constant 0.000000e+00 : f32
    %33 = vector.broadcast %cst_20 : f32 to vector<16x32xf32>
    %34 = vector.extract_strided_slice %28 {offsets = [0, 0, 0], sizes = [2, 8, 8], strides = [1, 1, 1]} : vector<2x8x32xbf16> to vector<2x8x8xbf16>
    %35 = vector.extract_strided_slice %30 {offsets = [0, 0, 0], sizes = [2, 8, 8], strides = [1, 1, 1]} : vector<2x8x32xbf16> to vector<2x8x8xbf16>
    "tpu.trace_start"() <{level = 10 : i32, message = "btd,bsd->bts"}> : () -> ()
    %cst_21 = arith.constant dense<0.000000e+00> : vector<2x8x8xf32>
    %36 = tpu.matmul %34, %35, %cst_21 {dimension_numbers = #tpu.dot_dimension_numbers<[2], [2], [1], [1], [0, 0, 0, 1, 1, 1], [0], [0]>} : vector<2x8x8xbf16>, vector<2x8x8xbf16>, vector<2x8x8xf32> -> vector<2x8x8xf32>
    "tpu.trace_stop"() : () -> ()
    %cst_22 = arith.constant dense<0xFF800000> : vector<2x8xf32>
    %37 = vector.multi_reduction <maximumf>, %36, %cst_22 [2] : vector<2x8x8xf32> to vector<2x8xf32>
    %38 = vector.shape_cast %37 : vector<2x8xf32> to vector<2x8x1xf32>
    %39 = vector.broadcast %38 : vector<2x8x1xf32> to vector<2x8x8xf32>
    %40 = arith.subf %36, %39 : vector<2x8x8xf32>
    %41 = math.exp %40 : vector<2x8x8xf32>
    %cst_23 = arith.constant dense<0.000000e+00> : vector<2x8xf32>
    %42 = vector.multi_reduction <add>, %41, %cst_23 [2] : vector<2x8x8xf32> to vector<2x8xf32>
    %43 = vector.shape_cast %42 : vector<2x8xf32> to vector<2x8x1xf32>
    %44 = tpu.reciprocal %43 {approx = true} : vector<2x8x1xf32> -> vector<2x8x1xf32>
    %45 = vector.broadcast %44 : vector<2x8x1xf32> to vector<2x8x8xf32>
    %46 = arith.mulf %41, %45 : vector<2x8x8xf32>
    %47 = arith.truncf %46 : vector<2x8x8xf32> to vector<2x8x8xbf16>
    %48 = vector.extract_strided_slice %32 {offsets = [0, 0, 0], sizes = [2, 8, 8], strides = [1, 1, 1]} : vector<2x8x32xbf16> to vector<2x8x8xbf16>
    "tpu.trace_start"() <{level = 10 : i32, message = "bts,bsd->btd"}> : () -> ()
    %cst_24 = arith.constant dense<0.000000e+00> : vector<2x8x8xf32>
    %49 = tpu.matmul %47, %48, %cst_24 {dimension_numbers = #tpu.dot_dimension_numbers<[2], [1], [1], [2], [0, 0, 0, 1, 1, 2], [0], [0]>} : vector<2x8x8xbf16>, vector<2x8x8xbf16>, vector<2x8x8xf32> -> vector<2x8x8xf32>
    "tpu.trace_stop"() : () -> ()
    %50 = vector.shape_cast %49 : vector<2x8x8xf32> to vector<16x8xf32>
    %51 = arith.truncf %50 : vector<16x8xf32> to vector<16x8xbf16>
    %c0_25 = arith.constant 0 : index
    %c0_26 = arith.constant 0 : index
    %c0_27 = arith.constant 0 : index
    %52 = vector.load %arg9[%c0_25, %c0_26, %c0_27] : memref<4x8x32xbf16, #tpu.memory_space<vmem>>, vector<1x8x32xbf16>
    %53 = vector.shape_cast %52 : vector<1x8x32xbf16> to vector<8x32xbf16>
    %cst_28 = arith.constant dense<0.000000e+00> : vector<16x32xf32>
    %54 = tpu.matmul %51, %53, %cst_28 {dimension_numbers = #tpu.dot_dimension_numbers<[1], [0], [0], [1], [0, 0, 1, 1], [], []>} : vector<16x8xbf16>, vector<8x32xbf16>, vector<16x32xf32> -> vector<16x32xf32>
    %55 = arith.addf %33, %54 : vector<16x32xf32>
    %56 = vector.extract_strided_slice %28 {offsets = [0, 0, 8], sizes = [2, 8, 8], strides = [1, 1, 1]} : vector<2x8x32xbf16> to vector<2x8x8xbf16>
    %57 = vector.extract_strided_slice %30 {offsets = [0, 0, 8], sizes = [2, 8, 8], strides = [1, 1, 1]} : vector<2x8x32xbf16> to vector<2x8x8xbf16>
    "tpu.trace_start"() <{level = 10 : i32, message = "btd,bsd->bts"}> : () -> ()
    %cst_29 = arith.constant dense<0.000000e+00> : vector<2x8x8xf32>
    %58 = tpu.matmul %56, %57, %cst_29 {dimension_numbers = #tpu.dot_dimension_numbers<[2], [2], [1], [1], [0, 0, 0, 1, 1, 1], [0], [0]>} : vector<2x8x8xbf16>, vector<2x8x8xbf16>, vector<2x8x8xf32> -> vector<2x8x8xf32>
    "tpu.trace_stop"() : () -> ()
    %cst_30 = arith.constant dense<0xFF800000> : vector<2x8xf32>
    %59 = vector.multi_reduction <maximumf>, %58, %cst_30 [2] : vector<2x8x8xf32> to vector<2x8xf32>
    %60 = vector.shape_cast %59 : vector<2x8xf32> to vector<2x8x1xf32>
    %61 = vector.broadcast %60 : vector<2x8x1xf32> to vector<2x8x8xf32>
    %62 = arith.subf %58, %61 : vector<2x8x8xf32>
    %63 = math.exp %62 : vector<2x8x8xf32>
    %cst_31 = arith.constant dense<0.000000e+00> : vector<2x8xf32>
    %64 = vector.multi_reduction <add>, %63, %cst_31 [2] : vector<2x8x8xf32> to vector<2x8xf32>
    %65 = vector.shape_cast %64 : vector<2x8xf32> to vector<2x8x1xf32>
    %66 = tpu.reciprocal %65 {approx = true} : vector<2x8x1xf32> -> vector<2x8x1xf32>
    %67 = vector.broadcast %66 : vector<2x8x1xf32> to vector<2x8x8xf32>
    %68 = arith.mulf %63, %67 : vector<2x8x8xf32>
    %69 = arith.truncf %68 : vector<2x8x8xf32> to vector<2x8x8xbf16>
    %70 = vector.extract_strided_slice %32 {offsets = [0, 0, 8], sizes = [2, 8, 8], strides = [1, 1, 1]} : vector<2x8x32xbf16> to vector<2x8x8xbf16>
    "tpu.trace_start"() <{level = 10 : i32, message = "bts,bsd->btd"}> : () -> ()
    %cst_32 = arith.constant dense<0.000000e+00> : vector<2x8x8xf32>
    %71 = tpu.matmul %69, %70, %cst_32 {dimension_numbers = #tpu.dot_dimension_numbers<[2], [1], [1], [2], [0, 0, 0, 1, 1, 2], [0], [0]>} : vector<2x8x8xbf16>, vector<2x8x8xbf16>, vector<2x8x8xf32> -> vector<2x8x8xf32>
    "tpu.trace_stop"() : () -> ()
    %72 = vector.shape_cast %71 : vector<2x8x8xf32> to vector<16x8xf32>
    %73 = arith.truncf %72 : vector<16x8xf32> to vector<16x8xbf16>
    %c1 = arith.constant 1 : index
    %c0_33 = arith.constant 0 : index
    %c0_34 = arith.constant 0 : index
    %74 = vector.load %arg9[%c1, %c0_33, %c0_34] : memref<4x8x32xbf16, #tpu.memory_space<vmem>>, vector<1x8x32xbf16>
    %75 = vector.shape_cast %74 : vector<1x8x32xbf16> to vector<8x32xbf16>
    %cst_35 = arith.constant dense<0.000000e+00> : vector<16x32xf32>
    %76 = tpu.matmul %73, %75, %cst_35 {dimension_numbers = #tpu.dot_dimension_numbers<[1], [0], [0], [1], [0, 0, 1, 1], [], []>} : vector<16x8xbf16>, vector<8x32xbf16>, vector<16x32xf32> -> vector<16x32xf32>
    %77 = arith.addf %55, %76 : vector<16x32xf32>
    %78 = vector.extract_strided_slice %28 {offsets = [0, 0, 16], sizes = [2, 8, 8], strides = [1, 1, 1]} : vector<2x8x32xbf16> to vector<2x8x8xbf16>
    %79 = vector.extract_strided_slice %30 {offsets = [0, 0, 16], sizes = [2, 8, 8], strides = [1, 1, 1]} : vector<2x8x32xbf16> to vector<2x8x8xbf16>
    "tpu.trace_start"() <{level = 10 : i32, message = "btd,bsd->bts"}> : () -> ()
    %cst_36 = arith.constant dense<0.000000e+00> : vector<2x8x8xf32>
    %80 = tpu.matmul %78, %79, %cst_36 {dimension_numbers = #tpu.dot_dimension_numbers<[2], [2], [1], [1], [0, 0, 0, 1, 1, 1], [0], [0]>} : vector<2x8x8xbf16>, vector<2x8x8xbf16>, vector<2x8x8xf32> -> vector<2x8x8xf32>
    "tpu.trace_stop"() : () -> ()
    %cst_37 = arith.constant dense<0xFF800000> : vector<2x8xf32>
    %81 = vector.multi_reduction <maximumf>, %80, %cst_37 [2] : vector<2x8x8xf32> to vector<2x8xf32>
    %82 = vector.shape_cast %81 : vector<2x8xf32> to vector<2x8x1xf32>
    %83 = vector.broadcast %82 : vector<2x8x1xf32> to vector<2x8x8xf32>
    %84 = arith.subf %80, %83 : vector<2x8x8xf32>
    %85 = math.exp %84 : vector<2x8x8xf32>
    %cst_38 = arith.constant dense<0.000000e+00> : vector<2x8xf32>
    %86 = vector.multi_reduction <add>, %85, %cst_38 [2] : vector<2x8x8xf32> to vector<2x8xf32>
    %87 = vector.shape_cast %86 : vector<2x8xf32> to vector<2x8x1xf32>
    %88 = tpu.reciprocal %87 {approx = true} : vector<2x8x1xf32> -> vector<2x8x1xf32>
    %89 = vector.broadcast %88 : vector<2x8x1xf32> to vector<2x8x8xf32>
    %90 = arith.mulf %85, %89 : vector<2x8x8xf32>
    %91 = arith.truncf %90 : vector<2x8x8xf32> to vector<2x8x8xbf16>
    %92 = vector.extract_strided_slice %32 {offsets = [0, 0, 16], sizes = [2, 8, 8], strides = [1, 1, 1]} : vector<2x8x32xbf16> to vector<2x8x8xbf16>
    "tpu.trace_start"() <{level = 10 : i32, message = "bts,bsd->btd"}> : () -> ()
    %cst_39 = arith.constant dense<0.000000e+00> : vector<2x8x8xf32>
    %93 = tpu.matmul %91, %92, %cst_39 {dimension_numbers = #tpu.dot_dimension_numbers<[2], [1], [1], [2], [0, 0, 0, 1, 1, 2], [0], [0]>} : vector<2x8x8xbf16>, vector<2x8x8xbf16>, vector<2x8x8xf32> -> vector<2x8x8xf32>
    "tpu.trace_stop"() : () -> ()
    %94 = vector.shape_cast %93 : vector<2x8x8xf32> to vector<16x8xf32>
    %95 = arith.truncf %94 : vector<16x8xf32> to vector<16x8xbf16>
    %c2 = arith.constant 2 : index
    %c0_40 = arith.constant 0 : index
    %c0_41 = arith.constant 0 : index
    %96 = vector.load %arg9[%c2, %c0_40, %c0_41] : memref<4x8x32xbf16, #tpu.memory_space<vmem>>, vector<1x8x32xbf16>
    %97 = vector.shape_cast %96 : vector<1x8x32xbf16> to vector<8x32xbf16>
    %cst_42 = arith.constant dense<0.000000e+00> : vector<16x32xf32>
    %98 = tpu.matmul %95, %97, %cst_42 {dimension_numbers = #tpu.dot_dimension_numbers<[1], [0], [0], [1], [0, 0, 1, 1], [], []>} : vector<16x8xbf16>, vector<8x32xbf16>, vector<16x32xf32> -> vector<16x32xf32>
    %99 = arith.addf %77, %98 : vector<16x32xf32>
    %100 = vector.extract_strided_slice %28 {offsets = [0, 0, 24], sizes = [2, 8, 8], strides = [1, 1, 1]} : vector<2x8x32xbf16> to vector<2x8x8xbf16>
    %101 = vector.extract_strided_slice %30 {offsets = [0, 0, 24], sizes = [2, 8, 8], strides = [1, 1, 1]} : vector<2x8x32xbf16> to vector<2x8x8xbf16>
    "tpu.trace_start"() <{level = 10 : i32, message = "btd,bsd->bts"}> : () -> ()
    %cst_43 = arith.constant dense<0.000000e+00> : vector<2x8x8xf32>
    %102 = tpu.matmul %100, %101, %cst_43 {dimension_numbers = #tpu.dot_dimension_numbers<[2], [2], [1], [1], [0, 0, 0, 1, 1, 1], [0], [0]>} : vector<2x8x8xbf16>, vector<2x8x8xbf16>, vector<2x8x8xf32> -> vector<2x8x8xf32>
    "tpu.trace_stop"() : () -> ()
    %cst_44 = arith.constant dense<0xFF800000> : vector<2x8xf32>
    %103 = vector.multi_reduction <maximumf>, %102, %cst_44 [2] : vector<2x8x8xf32> to vector<2x8xf32>
    %104 = vector.shape_cast %103 : vector<2x8xf32> to vector<2x8x1xf32>
    %105 = vector.broadcast %104 : vector<2x8x1xf32> to vector<2x8x8xf32>
    %106 = arith.subf %102, %105 : vector<2x8x8xf32>
    %107 = math.exp %106 : vector<2x8x8xf32>
    %cst_45 = arith.constant dense<0.000000e+00> : vector<2x8xf32>
    %108 = vector.multi_reduction <add>, %107, %cst_45 [2] : vector<2x8x8xf32> to vector<2x8xf32>
    %109 = vector.shape_cast %108 : vector<2x8xf32> to vector<2x8x1xf32>
    %110 = tpu.reciprocal %109 {approx = true} : vector<2x8x1xf32> -> vector<2x8x1xf32>
    %111 = vector.broadcast %110 : vector<2x8x1xf32> to vector<2x8x8xf32>
    %112 = arith.mulf %107, %111 : vector<2x8x8xf32>
    %113 = arith.truncf %112 : vector<2x8x8xf32> to vector<2x8x8xbf16>
    %114 = vector.extract_strided_slice %32 {offsets = [0, 0, 24], sizes = [2, 8, 8], strides = [1, 1, 1]} : vector<2x8x32xbf16> to vector<2x8x8xbf16>
    "tpu.trace_start"() <{level = 10 : i32, message = "bts,bsd->btd"}> : () -> ()
    %cst_46 = arith.constant dense<0.000000e+00> : vector<2x8x8xf32>
    %115 = tpu.matmul %113, %114, %cst_46 {dimension_numbers = #tpu.dot_dimension_numbers<[2], [1], [1], [2], [0, 0, 0, 1, 1, 2], [0], [0]>} : vector<2x8x8xbf16>, vector<2x8x8xbf16>, vector<2x8x8xf32> -> vector<2x8x8xf32>
    "tpu.trace_stop"() : () -> ()
    %116 = vector.shape_cast %115 : vector<2x8x8xf32> to vector<16x8xf32>
    %117 = arith.truncf %116 : vector<16x8xf32> to vector<16x8xbf16>
    %c3 = arith.constant 3 : index
    %c0_47 = arith.constant 0 : index
    %c0_48 = arith.constant 0 : index
    %118 = vector.load %arg9[%c3, %c0_47, %c0_48] : memref<4x8x32xbf16, #tpu.memory_space<vmem>>, vector<1x8x32xbf16>
    %119 = vector.shape_cast %118 : vector<1x8x32xbf16> to vector<8x32xbf16>
    %cst_49 = arith.constant dense<0.000000e+00> : vector<16x32xf32>
    %120 = tpu.matmul %117, %119, %cst_49 {dimension_numbers = #tpu.dot_dimension_numbers<[1], [0], [0], [1], [0, 0, 1, 1], [], []>} : vector<16x8xbf16>, vector<8x32xbf16>, vector<16x32xf32> -> vector<16x32xf32>
    %121 = arith.addf %99, %120 : vector<16x32xf32>
    %c0_50 = arith.constant 0 : index
    %c0_51 = arith.constant 0 : index
    %122 = vector.load %arg10[%c0_50, %c0_51] : memref<1x32xf32, #tpu.memory_space<vmem>>, vector<1x32xf32>
    %123 = vector.shape_cast %122 : vector<1x32xf32> to vector<32xf32>
    %124 = vector.shape_cast %123 : vector<32xf32> to vector<1x32xf32>
    %125 = vector.broadcast %124 : vector<1x32xf32> to vector<16x32xf32>
    %126 = arith.addf %121, %125 : vector<16x32xf32>
    %127 = arith.addf %1, %126 : vector<16x32xf32>
    %cst_52 = arith.constant dense<0.000000e+00> : vector<16xf32>
    %128 = vector.multi_reduction <add>, %127, %cst_52 [1] : vector<16x32xf32> to vector<16xf32>
    %129 = vector.shape_cast %128 : vector<16xf32> to vector<16x1xf32>
    %cst_53 = arith.constant 3.125000e-02 : f32
    %130 = vector.broadcast %cst_53 : f32 to vector<16x1xf32>
    %131 = arith.mulf %129, %130 : vector<16x1xf32>
    %132 = vector.broadcast %131 : vector<16x1xf32> to vector<16x32xf32>
    %133 = arith.subf %127, %132 : vector<16x32xf32>
    %134 = arith.mulf %133, %133 : vector<16x32xf32>
    %cst_54 = arith.constant dense<0.000000e+00> : vector<16xf32>
    %135 = vector.multi_reduction <add>, %134, %cst_54 [1] : vector<16x32xf32> to vector<16xf32>
    %136 = vector.shape_cast %135 : vector<16xf32> to vector<16x1xf32>
    %cst_55 = arith.constant 3.125000e-02 : f32
    %137 = vector.broadcast %cst_55 : f32 to vector<16x1xf32>
    %138 = arith.mulf %136, %137 : vector<16x1xf32>
    %cst_56 = arith.constant 9.99999974E-6 : f32
    %139 = vector.broadcast %cst_56 : f32 to vector<16x1xf32>
    %140 = arith.addf %138, %139 : vector<16x1xf32>
    %141 = math.rsqrt %140 : vector<16x1xf32>
    %142 = vector.broadcast %141 : vector<16x1xf32> to vector<16x32xf32>
    %143 = arith.mulf %133, %142 : vector<16x32xf32>
    %c0_57 = arith.constant 0 : index
    %c0_58 = arith.constant 0 : index
    %144 = vector.load %arg23[%c0_57, %c0_58] : memref<1x32xf32, #tpu.memory_space<vmem>>, vector<1x32xf32>
    %145 = vector.shape_cast %144 : vector<1x32xf32> to vector<32xf32>
    %146 = vector.shape_cast %145 : vector<32xf32> to vector<1x32xf32>
    %147 = vector.broadcast %146 : vector<1x32xf32> to vector<16x32xf32>
    %148 = arith.mulf %143, %147 : vector<16x32xf32>
    %c0_59 = arith.constant 0 : index
    %c0_60 = arith.constant 0 : index
    %149 = vector.load %arg24[%c0_59, %c0_60] : memref<1x32xf32, #tpu.memory_space<vmem>>, vector<1x32xf32>
    %150 = vector.shape_cast %149 : vector<1x32xf32> to vector<32xf32>
    %151 = vector.shape_cast %150 : vector<32xf32> to vector<1x32xf32>
    %152 = vector.broadcast %151 : vector<1x32xf32> to vector<16x32xf32>
    %153 = arith.addf %148, %152 : vector<16x32xf32>
    %154 = arith.addf %153, %3 : vector<16x32xf32>
    %155 = arith.truncf %154 : vector<16x32xf32> to vector<16x32xbf16>
    %c0_61 = arith.constant 0 : index
    %c0_62 = arith.constant 0 : index
    %156 = vector.load %arg11[%c0_61, %c0_62] : memref<32x32xbf16, #tpu.memory_space<vmem>>, vector<32x32xbf16>
    %cst_63 = arith.constant dense<0.000000e+00> : vector<16x32xf32>
    %157 = tpu.matmul %155, %156, %cst_63 {dimension_numbers = #tpu.dot_dimension_numbers<[1], [0], [0], [1], [0, 0, 1, 1], [], []>} : vector<16x32xbf16>, vector<32x32xbf16>, vector<16x32xf32> -> vector<16x32xf32>
    %c0_64 = arith.constant 0 : index
    %c0_65 = arith.constant 0 : index
    %158 = vector.load %arg12[%c0_64, %c0_65] : memref<1x32xf32, #tpu.memory_space<vmem>>, vector<1x32xf32>
    %159 = vector.shape_cast %158 : vector<1x32xf32> to vector<32xf32>
    %160 = vector.shape_cast %159 : vector<32xf32> to vector<1x32xf32>
    %161 = vector.broadcast %160 : vector<1x32xf32> to vector<16x32xf32>
    %162 = arith.addf %157, %161 : vector<16x32xf32>
    %163 = arith.addf %5, %7 : vector<32x32xf32>
    %164 = arith.truncf %163 : vector<32x32xf32> to vector<32x32xbf16>
    %c0_66 = arith.constant 0 : index
    %c0_67 = arith.constant 0 : index
    %165 = vector.load %arg13[%c0_66, %c0_67] : memref<32x32xbf16, #tpu.memory_space<vmem>>, vector<32x32xbf16>
    %cst_68 = arith.constant dense<0.000000e+00> : vector<32x32xf32>
    %166 = tpu.matmul %164, %165, %cst_68 {dimension_numbers = #tpu.dot_dimension_numbers<[1], [0], [0], [1], [0, 0, 1, 1], [], []>} : vector<32x32xbf16>, vector<32x32xbf16>, vector<32x32xf32> -> vector<32x32xf32>
    %c0_69 = arith.constant 0 : index
    %c0_70 = arith.constant 0 : index
    %167 = vector.load %arg14[%c0_69, %c0_70] : memref<1x32xf32, #tpu.memory_space<vmem>>, vector<1x32xf32>
    %168 = vector.shape_cast %167 : vector<1x32xf32> to vector<32xf32>
    %169 = vector.shape_cast %168 : vector<32xf32> to vector<1x32xf32>
    %170 = vector.broadcast %169 : vector<1x32xf32> to vector<32x32xf32>
    %171 = arith.addf %166, %170 : vector<32x32xf32>
    %172 = arith.truncf %5 : vector<32x32xf32> to vector<32x32xbf16>
    %c0_71 = arith.constant 0 : index
    %c0_72 = arith.constant 0 : index
    %173 = vector.load %arg15[%c0_71, %c0_72] : memref<32x32xbf16, #tpu.memory_space<vmem>>, vector<32x32xbf16>
    %cst_73 = arith.constant dense<0.000000e+00> : vector<32x32xf32>
    %174 = tpu.matmul %172, %173, %cst_73 {dimension_numbers = #tpu.dot_dimension_numbers<[1], [0], [0], [1], [0, 0, 1, 1], [], []>} : vector<32x32xbf16>, vector<32x32xbf16>, vector<32x32xf32> -> vector<32x32xf32>
    %c0_74 = arith.constant 0 : index
    %c0_75 = arith.constant 0 : index
    %175 = vector.load %arg16[%c0_74, %c0_75] : memref<1x32xf32, #tpu.memory_space<vmem>>, vector<1x32xf32>
    %176 = vector.shape_cast %175 : vector<1x32xf32> to vector<32xf32>
    %177 = vector.shape_cast %176 : vector<32xf32> to vector<1x32xf32>
    %178 = vector.broadcast %177 : vector<1x32xf32> to vector<32x32xf32>
    %179 = arith.addf %174, %178 : vector<32x32xf32>
    %180 = vector.shape_cast %162 : vector<16x32xf32> to vector<2x8x32xf32>
    %181 = arith.truncf %180 : vector<2x8x32xf32> to vector<2x8x32xbf16>
    %182 = vector.shape_cast %171 : vector<32x32xf32> to vector<2x16x32xf32>
    %183 = arith.truncf %182 : vector<2x16x32xf32> to vector<2x16x32xbf16>
    %184 = vector.shape_cast %179 : vector<32x32xf32> to vector<2x16x32xf32>
    %185 = arith.truncf %184 : vector<2x16x32xf32> to vector<2x16x32xbf16>
    %cst_76 = arith.constant 0.000000e+00 : f32
    %186 = vector.broadcast %cst_76 : f32 to vector<16x32xf32>
    %187 = vector.extract_strided_slice %181 {offsets = [0, 0, 0], sizes = [2, 8, 8], strides = [1, 1, 1]} : vector<2x8x32xbf16> to vector<2x8x8xbf16>
    %188 = vector.extract_strided_slice %183 {offsets = [0, 0, 0], sizes = [2, 16, 8], strides = [1, 1, 1]} : vector<2x16x32xbf16> to vector<2x16x8xbf16>
    "tpu.trace_start"() <{level = 10 : i32, message = "btd,bsd->bts"}> : () -> ()
    %cst_77 = arith.constant dense<0.000000e+00> : vector<2x8x16xf32>
    %189 = tpu.matmul %187, %188, %cst_77 {dimension_numbers = #tpu.dot_dimension_numbers<[2], [2], [1], [1], [0, 0, 0, 1, 1, 1], [0], [0]>} : vector<2x8x8xbf16>, vector<2x16x8xbf16>, vector<2x8x16xf32> -> vector<2x8x16xf32>
    "tpu.trace_stop"() : () -> ()
    %cst_78 = arith.constant dense<0xFF800000> : vector<2x8xf32>
    %190 = vector.multi_reduction <maximumf>, %189, %cst_78 [2] : vector<2x8x16xf32> to vector<2x8xf32>
    %191 = vector.shape_cast %190 : vector<2x8xf32> to vector<2x8x1xf32>
    %192 = vector.broadcast %191 : vector<2x8x1xf32> to vector<2x8x16xf32>
    %193 = arith.subf %189, %192 : vector<2x8x16xf32>
    %194 = math.exp %193 : vector<2x8x16xf32>
    %cst_79 = arith.constant dense<0.000000e+00> : vector<2x8xf32>
    %195 = vector.multi_reduction <add>, %194, %cst_79 [2] : vector<2x8x16xf32> to vector<2x8xf32>
    %196 = vector.shape_cast %195 : vector<2x8xf32> to vector<2x8x1xf32>
    %197 = tpu.reciprocal %196 {approx = true} : vector<2x8x1xf32> -> vector<2x8x1xf32>
    %198 = vector.broadcast %197 : vector<2x8x1xf32> to vector<2x8x16xf32>
    %199 = arith.mulf %194, %198 : vector<2x8x16xf32>
    %200 = arith.truncf %199 : vector<2x8x16xf32> to vector<2x8x16xbf16>
    %201 = vector.extract_strided_slice %185 {offsets = [0, 0, 0], sizes = [2, 16, 8], strides = [1, 1, 1]} : vector<2x16x32xbf16> to vector<2x16x8xbf16>
    "tpu.trace_start"() <{level = 10 : i32, message = "bts,bsd->btd"}> : () -> ()
    %cst_80 = arith.constant dense<0.000000e+00> : vector<2x8x8xf32>
    %202 = tpu.matmul %200, %201, %cst_80 {dimension_numbers = #tpu.dot_dimension_numbers<[2], [1], [1], [2], [0, 0, 0, 1, 1, 2], [0], [0]>} : vector<2x8x16xbf16>, vector<2x16x8xbf16>, vector<2x8x8xf32> -> vector<2x8x8xf32>
    "tpu.trace_stop"() : () -> ()
    %203 = vector.shape_cast %202 : vector<2x8x8xf32> to vector<16x8xf32>
    %204 = arith.truncf %203 : vector<16x8xf32> to vector<16x8xbf16>
    %c0_81 = arith.constant 0 : index
    %c0_82 = arith.constant 0 : index
    %c0_83 = arith.constant 0 : index
    %205 = vector.load %arg17[%c0_81, %c0_82, %c0_83] : memref<4x8x32xbf16, #tpu.memory_space<vmem>>, vector<1x8x32xbf16>
    %206 = vector.shape_cast %205 : vector<1x8x32xbf16> to vector<8x32xbf16>
    %cst_84 = arith.constant dense<0.000000e+00> : vector<16x32xf32>
    %207 = tpu.matmul %204, %206, %cst_84 {dimension_numbers = #tpu.dot_dimension_numbers<[1], [0], [0], [1], [0, 0, 1, 1], [], []>} : vector<16x8xbf16>, vector<8x32xbf16>, vector<16x32xf32> -> vector<16x32xf32>
    %208 = arith.addf %186, %207 : vector<16x32xf32>
    %209 = vector.extract_strided_slice %181 {offsets = [0, 0, 8], sizes = [2, 8, 8], strides = [1, 1, 1]} : vector<2x8x32xbf16> to vector<2x8x8xbf16>
    %210 = vector.extract_strided_slice %183 {offsets = [0, 0, 8], sizes = [2, 16, 8], strides = [1, 1, 1]} : vector<2x16x32xbf16> to vector<2x16x8xbf16>
    "tpu.trace_start"() <{level = 10 : i32, message = "btd,bsd->bts"}> : () -> ()
    %cst_85 = arith.constant dense<0.000000e+00> : vector<2x8x16xf32>
    %211 = tpu.matmul %209, %210, %cst_85 {dimension_numbers = #tpu.dot_dimension_numbers<[2], [2], [1], [1], [0, 0, 0, 1, 1, 1], [0], [0]>} : vector<2x8x8xbf16>, vector<2x16x8xbf16>, vector<2x8x16xf32> -> vector<2x8x16xf32>
    "tpu.trace_stop"() : () -> ()
    %cst_86 = arith.constant dense<0xFF800000> : vector<2x8xf32>
    %212 = vector.multi_reduction <maximumf>, %211, %cst_86 [2] : vector<2x8x16xf32> to vector<2x8xf32>
    %213 = vector.shape_cast %212 : vector<2x8xf32> to vector<2x8x1xf32>
    %214 = vector.broadcast %213 : vector<2x8x1xf32> to vector<2x8x16xf32>
    %215 = arith.subf %211, %214 : vector<2x8x16xf32>
    %216 = math.exp %215 : vector<2x8x16xf32>
    %cst_87 = arith.constant dense<0.000000e+00> : vector<2x8xf32>
    %217 = vector.multi_reduction <add>, %216, %cst_87 [2] : vector<2x8x16xf32> to vector<2x8xf32>
    %218 = vector.shape_cast %217 : vector<2x8xf32> to vector<2x8x1xf32>
    %219 = tpu.reciprocal %218 {approx = true} : vector<2x8x1xf32> -> vector<2x8x1xf32>
    %220 = vector.broadcast %219 : vector<2x8x1xf32> to vector<2x8x16xf32>
    %221 = arith.mulf %216, %220 : vector<2x8x16xf32>
    %222 = arith.truncf %221 : vector<2x8x16xf32> to vector<2x8x16xbf16>
    %223 = vector.extract_strided_slice %185 {offsets = [0, 0, 8], sizes = [2, 16, 8], strides = [1, 1, 1]} : vector<2x16x32xbf16> to vector<2x16x8xbf16>
    "tpu.trace_start"() <{level = 10 : i32, message = "bts,bsd->btd"}> : () -> ()
    %cst_88 = arith.constant dense<0.000000e+00> : vector<2x8x8xf32>
    %224 = tpu.matmul %222, %223, %cst_88 {dimension_numbers = #tpu.dot_dimension_numbers<[2], [1], [1], [2], [0, 0, 0, 1, 1, 2], [0], [0]>} : vector<2x8x16xbf16>, vector<2x16x8xbf16>, vector<2x8x8xf32> -> vector<2x8x8xf32>
    "tpu.trace_stop"() : () -> ()
    %225 = vector.shape_cast %224 : vector<2x8x8xf32> to vector<16x8xf32>
    %226 = arith.truncf %225 : vector<16x8xf32> to vector<16x8xbf16>
    %c1_89 = arith.constant 1 : index
    %c0_90 = arith.constant 0 : index
    %c0_91 = arith.constant 0 : index
    %227 = vector.load %arg17[%c1_89, %c0_90, %c0_91] : memref<4x8x32xbf16, #tpu.memory_space<vmem>>, vector<1x8x32xbf16>
    %228 = vector.shape_cast %227 : vector<1x8x32xbf16> to vector<8x32xbf16>
    %cst_92 = arith.constant dense<0.000000e+00> : vector<16x32xf32>
    %229 = tpu.matmul %226, %228, %cst_92 {dimension_numbers = #tpu.dot_dimension_numbers<[1], [0], [0], [1], [0, 0, 1, 1], [], []>} : vector<16x8xbf16>, vector<8x32xbf16>, vector<16x32xf32> -> vector<16x32xf32>
    %230 = arith.addf %208, %229 : vector<16x32xf32>
    %231 = vector.extract_strided_slice %181 {offsets = [0, 0, 16], sizes = [2, 8, 8], strides = [1, 1, 1]} : vector<2x8x32xbf16> to vector<2x8x8xbf16>
    %232 = vector.extract_strided_slice %183 {offsets = [0, 0, 16], sizes = [2, 16, 8], strides = [1, 1, 1]} : vector<2x16x32xbf16> to vector<2x16x8xbf16>
    "tpu.trace_start"() <{level = 10 : i32, message = "btd,bsd->bts"}> : () -> ()
    %cst_93 = arith.constant dense<0.000000e+00> : vector<2x8x16xf32>
    %233 = tpu.matmul %231, %232, %cst_93 {dimension_numbers = #tpu.dot_dimension_numbers<[2], [2], [1], [1], [0, 0, 0, 1, 1, 1], [0], [0]>} : vector<2x8x8xbf16>, vector<2x16x8xbf16>, vector<2x8x16xf32> -> vector<2x8x16xf32>
    "tpu.trace_stop"() : () -> ()
    %cst_94 = arith.constant dense<0xFF800000> : vector<2x8xf32>
    %234 = vector.multi_reduction <maximumf>, %233, %cst_94 [2] : vector<2x8x16xf32> to vector<2x8xf32>
    %235 = vector.shape_cast %234 : vector<2x8xf32> to vector<2x8x1xf32>
    %236 = vector.broadcast %235 : vector<2x8x1xf32> to vector<2x8x16xf32>
    %237 = arith.subf %233, %236 : vector<2x8x16xf32>
    %238 = math.exp %237 : vector<2x8x16xf32>
    %cst_95 = arith.constant dense<0.000000e+00> : vector<2x8xf32>
    %239 = vector.multi_reduction <add>, %238, %cst_95 [2] : vector<2x8x16xf32> to vector<2x8xf32>
    %240 = vector.shape_cast %239 : vector<2x8xf32> to vector<2x8x1xf32>
    %241 = tpu.reciprocal %240 {approx = true} : vector<2x8x1xf32> -> vector<2x8x1xf32>
    %242 = vector.broadcast %241 : vector<2x8x1xf32> to vector<2x8x16xf32>
    %243 = arith.mulf %238, %242 : vector<2x8x16xf32>
    %244 = arith.truncf %243 : vector<2x8x16xf32> to vector<2x8x16xbf16>
    %245 = vector.extract_strided_slice %185 {offsets = [0, 0, 16], sizes = [2, 16, 8], strides = [1, 1, 1]} : vector<2x16x32xbf16> to vector<2x16x8xbf16>
    "tpu.trace_start"() <{level = 10 : i32, message = "bts,bsd->btd"}> : () -> ()
    %cst_96 = arith.constant dense<0.000000e+00> : vector<2x8x8xf32>
    %246 = tpu.matmul %244, %245, %cst_96 {dimension_numbers = #tpu.dot_dimension_numbers<[2], [1], [1], [2], [0, 0, 0, 1, 1, 2], [0], [0]>} : vector<2x8x16xbf16>, vector<2x16x8xbf16>, vector<2x8x8xf32> -> vector<2x8x8xf32>
    "tpu.trace_stop"() : () -> ()
    %247 = vector.shape_cast %246 : vector<2x8x8xf32> to vector<16x8xf32>
    %248 = arith.truncf %247 : vector<16x8xf32> to vector<16x8xbf16>
    %c2_97 = arith.constant 2 : index
    %c0_98 = arith.constant 0 : index
    %c0_99 = arith.constant 0 : index
    %249 = vector.load %arg17[%c2_97, %c0_98, %c0_99] : memref<4x8x32xbf16, #tpu.memory_space<vmem>>, vector<1x8x32xbf16>
    %250 = vector.shape_cast %249 : vector<1x8x32xbf16> to vector<8x32xbf16>
    %cst_100 = arith.constant dense<0.000000e+00> : vector<16x32xf32>
    %251 = tpu.matmul %248, %250, %cst_100 {dimension_numbers = #tpu.dot_dimension_numbers<[1], [0], [0], [1], [0, 0, 1, 1], [], []>} : vector<16x8xbf16>, vector<8x32xbf16>, vector<16x32xf32> -> vector<16x32xf32>
    %252 = arith.addf %230, %251 : vector<16x32xf32>
    %253 = vector.extract_strided_slice %181 {offsets = [0, 0, 24], sizes = [2, 8, 8], strides = [1, 1, 1]} : vector<2x8x32xbf16> to vector<2x8x8xbf16>
    %254 = vector.extract_strided_slice %183 {offsets = [0, 0, 24], sizes = [2, 16, 8], strides = [1, 1, 1]} : vector<2x16x32xbf16> to vector<2x16x8xbf16>
    "tpu.trace_start"() <{level = 10 : i32, message = "btd,bsd->bts"}> : () -> ()
    %cst_101 = arith.constant dense<0.000000e+00> : vector<2x8x16xf32>
    %255 = tpu.matmul %253, %254, %cst_101 {dimension_numbers = #tpu.dot_dimension_numbers<[2], [2], [1], [1], [0, 0, 0, 1, 1, 1], [0], [0]>} : vector<2x8x8xbf16>, vector<2x16x8xbf16>, vector<2x8x16xf32> -> vector<2x8x16xf32>
    "tpu.trace_stop"() : () -> ()
    %cst_102 = arith.constant dense<0xFF800000> : vector<2x8xf32>
    %256 = vector.multi_reduction <maximumf>, %255, %cst_102 [2] : vector<2x8x16xf32> to vector<2x8xf32>
    %257 = vector.shape_cast %256 : vector<2x8xf32> to vector<2x8x1xf32>
    %258 = vector.broadcast %257 : vector<2x8x1xf32> to vector<2x8x16xf32>
    %259 = arith.subf %255, %258 : vector<2x8x16xf32>
    %260 = math.exp %259 : vector<2x8x16xf32>
    %cst_103 = arith.constant dense<0.000000e+00> : vector<2x8xf32>
    %261 = vector.multi_reduction <add>, %260, %cst_103 [2] : vector<2x8x16xf32> to vector<2x8xf32>
    %262 = vector.shape_cast %261 : vector<2x8xf32> to vector<2x8x1xf32>
    %263 = tpu.reciprocal %262 {approx = true} : vector<2x8x1xf32> -> vector<2x8x1xf32>
    %264 = vector.broadcast %263 : vector<2x8x1xf32> to vector<2x8x16xf32>
    %265 = arith.mulf %260, %264 : vector<2x8x16xf32>
    %266 = arith.truncf %265 : vector<2x8x16xf32> to vector<2x8x16xbf16>
    %267 = vector.extract_strided_slice %185 {offsets = [0, 0, 24], sizes = [2, 16, 8], strides = [1, 1, 1]} : vector<2x16x32xbf16> to vector<2x16x8xbf16>
    "tpu.trace_start"() <{level = 10 : i32, message = "bts,bsd->btd"}> : () -> ()
    %cst_104 = arith.constant dense<0.000000e+00> : vector<2x8x8xf32>
    %268 = tpu.matmul %266, %267, %cst_104 {dimension_numbers = #tpu.dot_dimension_numbers<[2], [1], [1], [2], [0, 0, 0, 1, 1, 2], [0], [0]>} : vector<2x8x16xbf16>, vector<2x16x8xbf16>, vector<2x8x8xf32> -> vector<2x8x8xf32>
    "tpu.trace_stop"() : () -> ()
    %269 = vector.shape_cast %268 : vector<2x8x8xf32> to vector<16x8xf32>
    %270 = arith.truncf %269 : vector<16x8xf32> to vector<16x8xbf16>
    %c3_105 = arith.constant 3 : index
    %c0_106 = arith.constant 0 : index
    %c0_107 = arith.constant 0 : index
    %271 = vector.load %arg17[%c3_105, %c0_106, %c0_107] : memref<4x8x32xbf16, #tpu.memory_space<vmem>>, vector<1x8x32xbf16>
    %272 = vector.shape_cast %271 : vector<1x8x32xbf16> to vector<8x32xbf16>
    %cst_108 = arith.constant dense<0.000000e+00> : vector<16x32xf32>
    %273 = tpu.matmul %270, %272, %cst_108 {dimension_numbers = #tpu.dot_dimension_numbers<[1], [0], [0], [1], [0, 0, 1, 1], [], []>} : vector<16x8xbf16>, vector<8x32xbf16>, vector<16x32xf32> -> vector<16x32xf32>
    %274 = arith.addf %252, %273 : vector<16x32xf32>
    %c0_109 = arith.constant 0 : index
    %c0_110 = arith.constant 0 : index
    %275 = vector.load %arg18[%c0_109, %c0_110] : memref<1x32xf32, #tpu.memory_space<vmem>>, vector<1x32xf32>
    %276 = vector.shape_cast %275 : vector<1x32xf32> to vector<32xf32>
    %277 = vector.shape_cast %276 : vector<32xf32> to vector<1x32xf32>
    %278 = vector.broadcast %277 : vector<1x32xf32> to vector<16x32xf32>
    %279 = arith.addf %274, %278 : vector<16x32xf32>
    %280 = arith.addf %153, %279 : vector<16x32xf32>
    %cst_111 = arith.constant dense<0.000000e+00> : vector<16xf32>
    %281 = vector.multi_reduction <add>, %280, %cst_111 [1] : vector<16x32xf32> to vector<16xf32>
    %282 = vector.shape_cast %281 : vector<16xf32> to vector<16x1xf32>
    %cst_112 = arith.constant 3.125000e-02 : f32
    %283 = vector.broadcast %cst_112 : f32 to vector<16x1xf32>
    %284 = arith.mulf %282, %283 : vector<16x1xf32>
    %285 = vector.broadcast %284 : vector<16x1xf32> to vector<16x32xf32>
    %286 = arith.subf %280, %285 : vector<16x32xf32>
    %287 = arith.mulf %286, %286 : vector<16x32xf32>
    %cst_113 = arith.constant dense<0.000000e+00> : vector<16xf32>
    %288 = vector.multi_reduction <add>, %287, %cst_113 [1] : vector<16x32xf32> to vector<16xf32>
    %289 = vector.shape_cast %288 : vector<16xf32> to vector<16x1xf32>
    %cst_114 = arith.constant 3.125000e-02 : f32
    %290 = vector.broadcast %cst_114 : f32 to vector<16x1xf32>
    %291 = arith.mulf %289, %290 : vector<16x1xf32>
    %cst_115 = arith.constant 9.99999974E-6 : f32
    %292 = vector.broadcast %cst_115 : f32 to vector<16x1xf32>
    %293 = arith.addf %291, %292 : vector<16x1xf32>
    %294 = math.rsqrt %293 : vector<16x1xf32>
    %295 = vector.broadcast %294 : vector<16x1xf32> to vector<16x32xf32>
    %296 = arith.mulf %286, %295 : vector<16x32xf32>
    %c0_116 = arith.constant 0 : index
    %c0_117 = arith.constant 0 : index
    %297 = vector.load %arg25[%c0_116, %c0_117] : memref<1x32xf32, #tpu.memory_space<vmem>>, vector<1x32xf32>
    %298 = vector.shape_cast %297 : vector<1x32xf32> to vector<32xf32>
    %299 = vector.shape_cast %298 : vector<32xf32> to vector<1x32xf32>
    %300 = vector.broadcast %299 : vector<1x32xf32> to vector<16x32xf32>
    %301 = arith.mulf %296, %300 : vector<16x32xf32>
    %c0_118 = arith.constant 0 : index
    %c0_119 = arith.constant 0 : index
    %302 = vector.load %arg26[%c0_118, %c0_119] : memref<1x32xf32, #tpu.memory_space<vmem>>, vector<1x32xf32>
    %303 = vector.shape_cast %302 : vector<1x32xf32> to vector<32xf32>
    %304 = vector.shape_cast %303 : vector<32xf32> to vector<1x32xf32>
    %305 = vector.broadcast %304 : vector<1x32xf32> to vector<16x32xf32>
    %306 = arith.addf %301, %305 : vector<16x32xf32>
    %307 = arith.truncf %306 : vector<16x32xf32> to vector<16x32xbf16>
    %c0_120 = arith.constant 0 : index
    %c0_121 = arith.constant 0 : index
    %308 = vector.load %arg19[%c0_120, %c0_121] : memref<32x64xbf16, #tpu.memory_space<vmem>>, vector<32x64xbf16>
    %cst_122 = arith.constant dense<0.000000e+00> : vector<16x64xf32>
    %309 = tpu.matmul %307, %308, %cst_122 {dimension_numbers = #tpu.dot_dimension_numbers<[1], [0], [0], [1], [0, 0, 1, 1], [], []>} : vector<16x32xbf16>, vector<32x64xbf16>, vector<16x64xf32> -> vector<16x64xf32>
    %c0_123 = arith.constant 0 : index
    %c0_124 = arith.constant 0 : index
    %310 = vector.load %arg20[%c0_123, %c0_124] : memref<1x64xf32, #tpu.memory_space<vmem>>, vector<1x64xf32>
    %311 = vector.shape_cast %310 : vector<1x64xf32> to vector<64xf32>
    %312 = vector.shape_cast %311 : vector<64xf32> to vector<1x64xf32>
    %313 = vector.broadcast %312 : vector<1x64xf32> to vector<16x64xf32>
    %314 = arith.addf %309, %313 : vector<16x64xf32>
    %cst_125 = arith.constant 0.000000e+00 : f32
    %315 = vector.broadcast %cst_125 : f32 to vector<16x64xf32>
    %316 = arith.maximumf %314, %315 : vector<16x64xf32>
    %317 = arith.truncf %316 : vector<16x64xf32> to vector<16x64xbf16>
    %c0_126 = arith.constant 0 : index
    %c0_127 = arith.constant 0 : index
    %318 = vector.load %arg21[%c0_126, %c0_127] : memref<64x32xbf16, #tpu.memory_space<vmem>>, vector<64x32xbf16>
    %cst_128 = arith.constant dense<0.000000e+00> : vector<16x32xf32>
    %319 = tpu.matmul %317, %318, %cst_128 {dimension_numbers = #tpu.dot_dimension_numbers<[1], [0], [0], [1], [0, 0, 1, 1], [], []>} : vector<16x64xbf16>, vector<64x32xbf16>, vector<16x32xf32> -> vector<16x32xf32>
    %c0_129 = arith.constant 0 : index
    %c0_130 = arith.constant 0 : index
    %320 = vector.load %arg22[%c0_129, %c0_130] : memref<1x32xf32, #tpu.memory_space<vmem>>, vector<1x32xf32>
    %321 = vector.shape_cast %320 : vector<1x32xf32> to vector<32xf32>
    %322 = vector.shape_cast %321 : vector<32xf32> to vector<1x32xf32>
    %323 = vector.broadcast %322 : vector<1x32xf32> to vector<16x32xf32>
    %324 = arith.addf %319, %323 : vector<16x32xf32>
    %325 = arith.addf %306, %324 : vector<16x32xf32>
    %cst_131 = arith.constant dense<0.000000e+00> : vector<16xf32>
    %326 = vector.multi_reduction <add>, %325, %cst_131 [1] : vector<16x32xf32> to vector<16xf32>
    %327 = vector.shape_cast %326 : vector<16xf32> to vector<16x1xf32>
    %cst_132 = arith.constant 3.125000e-02 : f32
    %328 = vector.broadcast %cst_132 : f32 to vector<16x1xf32>
    %329 = arith.mulf %327, %328 : vector<16x1xf32>
    %330 = vector.broadcast %329 : vector<16x1xf32> to vector<16x32xf32>
    %331 = arith.subf %325, %330 : vector<16x32xf32>
    %332 = arith.mulf %331, %331 : vector<16x32xf32>
    %cst_133 = arith.constant dense<0.000000e+00> : vector<16xf32>
    %333 = vector.multi_reduction <add>, %332, %cst_133 [1] : vector<16x32xf32> to vector<16xf32>
    %334 = vector.shape_cast %333 : vector<16xf32> to vector<16x1xf32>
    %cst_134 = arith.constant 3.125000e-02 : f32
    %335 = vector.broadcast %cst_134 : f32 to vector<16x1xf32>
    %336 = arith.mulf %334, %335 : vector<16x1xf32>
    %cst_135 = arith.constant 9.99999974E-6 : f32
    %337 = vector.broadcast %cst_135 : f32 to vector<16x1xf32>
    %338 = arith.addf %336, %337 : vector<16x1xf32>
    %339 = math.rsqrt %338 : vector<16x1xf32>
    %340 = vector.broadcast %339 : vector<16x1xf32> to vector<16x32xf32>
    %341 = arith.mulf %331, %340 : vector<16x32xf32>
    %c0_136 = arith.constant 0 : index
    %c0_137 = arith.constant 0 : index
    %342 = vector.load %arg27[%c0_136, %c0_137] : memref<1x32xf32, #tpu.memory_space<vmem>>, vector<1x32xf32>
    %343 = vector.shape_cast %342 : vector<1x32xf32> to vector<32xf32>
    %344 = vector.shape_cast %343 : vector<32xf32> to vector<1x32xf32>
    %345 = vector.broadcast %344 : vector<1x32xf32> to vector<16x32xf32>
    %346 = arith.mulf %341, %345 : vector<16x32xf32>
    %c0_138 = arith.constant 0 : index
    %c0_139 = arith.constant 0 : index
    %347 = vector.load %arg28[%c0_138, %c0_139] : memref<1x32xf32, #tpu.memory_space<vmem>>, vector<1x32xf32>
    %348 = vector.shape_cast %347 : vector<1x32xf32> to vector<32xf32>
    %349 = vector.shape_cast %348 : vector<32xf32> to vector<1x32xf32>
    %350 = vector.broadcast %349 : vector<1x32xf32> to vector<16x32xf32>
    %351 = arith.addf %346, %350 : vector<16x32xf32>
    %c0_140 = arith.constant 0 : index
    %c0_141 = arith.constant 0 : index
    %352 = vector.load %arg29[%c0_140, %c0_141] : memref<16x32xf32, #tpu.memory_space<vmem>>, vector<16x32xf32>
    tpu.vector_store %arg29[%c0_140, %c0_141], %351 {strides = array<i32>} : memref<16x32xf32, #tpu.memory_space<vmem>>, vector<16x32xf32>,
    return
  }
  func.func @transform_0(%arg0: i32) -> (i32, i32, i32) {
    %c0_i32 = arith.constant 0 : i32
    %c0_i32_0 = arith.constant 0 : i32
    %c0_i32_1 = arith.constant 0 : i32
    return %arg0, %c0_i32, %c0_i32_0 : i32, i32, i32
  }
  func.func @transform_1(%arg0: i32) -> (i32, i32, i32) {
    %c0_i32 = arith.constant 0 : i32
    %c0_i32_0 = arith.constant 0 : i32
    %c0_i32_1 = arith.constant 0 : i32
    return %arg0, %c0_i32, %c0_i32_0 : i32, i32, i32
  }
  func.func @transform_2(%arg0: i32) -> (i32, i32, i32) {
    %c0_i32 = arith.constant 0 : i32
    %c0_i32_0 = arith.constant 0 : i32
    %c0_i32_1 = arith.constant 0 : i32
    return %arg0, %c0_i32, %c0_i32_0 : i32, i32, i32
  }
  func.func @transform_3(%arg0: i32) -> (i32, i32, i32) {
    %c0_i32 = arith.constant 0 : i32
    %c0_i32_0 = arith.constant 0 : i32
    %c0_i32_1 = arith.constant 0 : i32
    return %arg0, %c0_i32, %c0_i32_0 : i32, i32, i32
  }
  func.func @transform_4(%arg0: i32) -> (i32, i32) {
    %c0_i32 = arith.constant 0 : i32
    %c0_i32_0 = arith.constant 0 : i32
    %c0_i32_1 = arith.constant 0 : i32
    return %c0_i32, %c0_i32_0 : i32, i32
  }
  func.func @transform_5(%arg0: i32) -> (i32, i32) {
    %c0_i32 = arith.constant 0 : i32
    %c0_i32_0 = arith.constant 0 : i32
    %c0_i32_1 = arith.constant 0 : i32
    return %c0_i32, %c0_i32_0 : i32, i32
  }
  func.func @transform_6(%arg0: i32) -> (i32, i32) {
    %c0_i32 = arith.constant 0 : i32
    %c0_i32_0 = arith.constant 0 : i32
    %c0_i32_1 = arith.constant 0 : i32
    return %c0_i32, %c0_i32_0 : i32, i32
  }
  func.func @transform_7(%arg0: i32) -> (i32, i32) {
    %c0_i32 = arith.constant 0 : i32
    %c0_i32_0 = arith.constant 0 : i32
    %c0_i32_1 = arith.constant 0 : i32
    return %c0_i32, %c0_i32_0 : i32, i32
  }
  func.func @transform_8(%arg0: i32) -> (i32, i32, i32) {
    %c0_i32 = arith.constant 0 : i32
    %c0_i32_0 = arith.constant 0 : i32
    %c0_i32_1 = arith.constant 0 : i32
    %c0_i32_2 = arith.constant 0 : i32
    return %c0_i32, %c0_i32_0, %c0_i32_1 : i32, i32, i32
  }
  func.func @transform_9(%arg0: i32) -> (i32, i32) {
    %c0_i32 = arith.constant 0 : i32
    %c0_i32_0 = arith.constant 0 : i32
    %c0_i32_1 = arith.constant 0 : i32
    return %c0_i32, %c0_i32_0 : i32, i32
  }
  func.func @transform_10(%arg0: i32) -> (i32, i32) {
    %c0_i32 = arith.constant 0 : i32
    %c0_i32_0 = arith.constant 0 : i32
    %c0_i32_1 = arith.constant 0 : i32
    return %c0_i32, %c0_i32_0 : i32, i32
  }
  func.func @transform_11(%arg0: i32) -> (i32, i32) {
    %c0_i32 = arith.constant 0 : i32
    %c0_i32_0 = arith.constant 0 : i32
    %c0_i32_1 = arith.constant 0 : i32
    return %c0_i32, %c0_i32_0 : i32, i32
  }
  func.func @transform_12(%arg0: i32) -> (i32, i32) {
    %c0_i32 = arith.constant 0 : i32
    %c0_i32_0 = arith.constant 0 : i32
    %c0_i32_1 = arith.constant 0 : i32
    return %c0_i32, %c0_i32_0 : i32, i32
  }
  func.func @transform_13(%arg0: i32) -> (i32, i32) {
    %c0_i32 = arith.constant 0 : i32
    %c0_i32_0 = arith.constant 0 : i32
    %c0_i32_1 = arith.constant 0 : i32
    return %c0_i32, %c0_i32_0 : i32, i32
  }
  func.func @transform_14(%arg0: i32) -> (i32, i32) {
    %c0_i32 = arith.constant 0 : i32
    %c0_i32_0 = arith.constant 0 : i32
    %c0_i32_1 = arith.constant 0 : i32
    return %c0_i32, %c0_i32_0 : i32, i32
  }
  func.func @transform_15(%arg0: i32) -> (i32, i32) {
    %c0_i32 = arith.constant 0 : i32
    %c0_i32_0 = arith.constant 0 : i32
    %c0_i32_1 = arith.constant 0 : i32
    return %c0_i32, %c0_i32_0 : i32, i32
  }
  func.func @transform_16(%arg0: i32) -> (i32, i32, i32) {
    %c0_i32 = arith.constant 0 : i32
    %c0_i32_0 = arith.constant 0 : i32
    %c0_i32_1 = arith.constant 0 : i32
    %c0_i32_2 = arith.constant 0 : i32
    return %c0_i32, %c0_i32_0, %c0_i32_1 : i32, i32, i32
  }
  func.func @transform_17(%arg0: i32) -> (i32, i32) {
    %c0_i32 = arith.constant 0 : i32
    %c0_i32_0 = arith.constant 0 : i32
    %c0_i32_1 = arith.constant 0 : i32
    return %c0_i32, %c0_i32_0 : i32, i32
  }
  func.func @transform_18(%arg0: i32) -> (i32, i32) {
    %c0_i32 = arith.constant 0 : i32
    %c0_i32_0 = arith.constant 0 : i32
    %c0_i32_1 = arith.constant 0 : i32
    return %c0_i32, %c0_i32_0 : i32, i32
  }
  func.func @transform_19(%arg0: i32) -> (i32, i32) {
    %c0_i32 = arith.constant 0 : i32
    %c0_i32_0 = arith.constant 0 : i32
    %c0_i32_1 = arith.constant 0 : i32
    return %c0_i32, %c0_i32_0 : i32, i32
  }
  func.func @transform_20(%arg0: i32) -> (i32, i32) {
    %c0_i32 = arith.constant 0 : i32
    %c0_i32_0 = arith.constant 0 : i32
    %c0_i32_1 = arith.constant 0 : i32
    return %c0_i32, %c0_i32_0 : i32, i32
  }
  func.func @transform_21(%arg0: i32) -> (i32, i32) {
    %c0_i32 = arith.constant 0 : i32
    %c0_i32_0 = arith.constant 0 : i32
    %c0_i32_1 = arith.constant 0 : i32
    return %c0_i32, %c0_i32_0 : i32, i32
  }
  func.func @transform_22(%arg0: i32) -> (i32, i32) {
    %c0_i32 = arith.constant 0 : i32
    %c0_i32_0 = arith.constant 0 : i32
    %c0_i32_1 = arith.constant 0 : i32
    return %c0_i32, %c0_i32_0 : i32, i32
  }
  func.func @transform_23(%arg0: i32) -> (i32, i32) {
    %c0_i32 = arith.constant 0 : i32
    %c0_i32_0 = arith.constant 0 : i32
    %c0_i32_1 = arith.constant 0 : i32
    return %c0_i32, %c0_i32_0 : i32, i32
  }
  func.func @transform_24(%arg0: i32) -> (i32, i32) {
    %c0_i32 = arith.constant 0 : i32
    %c0_i32_0 = arith.constant 0 : i32
    %c0_i32_1 = arith.constant 0 : i32
    return %c0_i32, %c0_i32_0 : i32, i32
  }
  func.func @transform_25(%arg0: i32) -> (i32, i32) {
    %c0_i32 = arith.constant 0 : i32
    %c0_i32_0 = arith.constant 0 : i32
    %c0_i32_1 = arith.constant 0 : i32
    return %c0_i32, %c0_i32_0 : i32, i32
  }
  func.func @transform_26(%arg0: i32) -> (i32, i32) {
    %c0_i32 = arith.constant 0 : i32
    %c0_i32_0 = arith.constant 0 : i32
    %c0_i32_1 = arith.constant 0 : i32
    return %c0_i32, %c0_i32_0 : i32, i32
  }
  func.func @transform_27(%arg0: i32) -> (i32, i32) {
    %c0_i32 = arith.constant 0 : i32
    %c0_i32_0 = arith.constant 0 : i32
    %c0_i32_1 = arith.constant 0 : i32
    return %c0_i32, %c0_i32_0 : i32, i32
  }
  func.func @transform_28(%arg0: i32) -> (i32, i32) {
    %c0_i32 = arith.constant 0 : i32
    %c0_i32_0 = arith.constant 0 : i32
    return %arg0, %c0_i32 : i32, i32
  }
}

</mosaic_0001>

<bundles_post_ra>
// kernel: tpu_custom_call.1
= control target key start
LH: loop header
LB: loop body
LE: loop exit
PB: predicated region body
PF: predicated region fallthrough
CT: control target
= control target key end

     0   :  { %s3230_s0 = inlined_call_operand.vmem [shape: f32[2,8,32], index: 0, kind: input, shape index: {}]   ;;  %s3231_s1 = inlined_call_operand.vmem [shape: f32[2,16,32], index: 1, kind: input, shape index: {}]   ;;  %s3232_s2 = inlined_call_operand.hbm [shape: f32[2,8,32], index: 2, kind: input, shape index: {}]   ;;  %s3233_s3 = inlined_call_operand.hbm [shape: f32[2,16,32], index: 3, kind: input, shape index: {}]   ;;  %s3234_s4 = inlined_call_operand.hbm [shape: bf16[32,64], index: 4, kind: input, shape index: {}]   ;;  %s3235_s5 = inlined_call_operand.vmem [shape: f32[1,64], index: 5, kind: input, shape index: {}]   ;;  %s3236_s6 = inlined_call_operand.hbm [shape: bf16[32,32], index: 6, kind: input, shape index: {}]   ;;  %s3237_s7 = inlined_call_operand.vmem [shape: f32[1,32], index: 7, kind: input, shape index: {}]   ;;  %s3238_s8 = inlined_call_operand.hbm [shape: bf16[4,8,32], index: 8, kind: input, shape index: {}]   ;;  %s3239_s9 = inlined_call_operand.vmem [shape: f32[1,32], index: 9, kind: input, shape index: {}]   ;;  %s3240_s10 = inlined_call_operand.hbm [shape: bf16[32,32], index: 10, kind: input, shape index: {}]   ;;  %s3241_s11 = inlined_call_operand.hbm [shape: f32[1,32], index: 11, kind: input, shape index: {}]   ;;  %s3242_s12 = inlined_call_operand.hbm [shape: bf16[32,32], index: 12, kind: input, shape index: {}]   ;;  %s3243_s13 = inlined_call_operand.hbm [shape: f32[1,32], index: 13, kind: input, shape index: {}]   ;;  %s3244_s14 = inlined_call_operand.hbm [shape: bf16[32,32], index: 14, kind: input, shape index: {}]   ;;  %s3245_s15 = inlined_call_operand.hbm [shape: f32[1,32], index: 15, kind: input, shape index: {}]   ;;  %s3246_s16 = inlined_call_operand.hbm [shape: bf16[4,8,32], index: 16, kind: input, shape index: {}]   ;;  %s3247_s17 = inlined_call_operand.hbm [shape: f32[1,32], index: 17, kind: input, shape index: {}]   ;;  %s3248_s18 = inlined_call_operand.hbm [shape: bf16[32,64], index: 18, kind: input, shape index: {}]   ;;  %s3249_s19 = inlined_call_operand.hbm [shape: f32[1,64], index: 19, kind: input, shape index: {}]   ;;  %s3250_s20 = inlined_call_operand.vmem [shape: bf16[64,32], index: 20, kind: input, shape index: {}]   ;;  %s3251_s21 = inlined_call_operand.vmem [shape: f32[1,32], index: 21, kind: input, shape index: {}]   ;;  %s3252_s22 = inlined_call_operand.vmem [shape: f32[1,32], index: 22, kind: input, shape index: {}]   ;;  %s3253_s23 = inlined_call_operand.vmem [shape: f32[1,32], index: 23, kind: input, shape index: {}]   ;;  %s3254_s24 = inlined_call_operand.vmem [shape: f32[1,32], index: 24, kind: input, shape index: {}]   ;;  %s3255_s25 = inlined_call_operand.vmem [shape: f32[1,32], index: 25, kind: input, shape index: {}]   ;;  %s3256_s26 = inlined_call_operand.hbm [shape: f32[1,32], index: 26, kind: input, shape index: {}]   ;;  %s3257_s27 = inlined_call_operand.vmem [shape: f32[1,32], index: 27, kind: input, shape index: {}]   ;;  %s3258_s28 = inlined_call_operand.hbm [shape: f32[16,32], index: 28, kind: output, shape index: {}]  }
   0x1   :  { %3265 = sst [smem:[#allocation39_spill]] %s3230_s0 }
   0x2   :  { %3266 = sst [smem:[#allocation40_spill]] %s3231_s1 }
   0x3   :  { %3267 = sst [smem:[#allocation41_spill]] %s3232_s2 }
   0x4   :  { %3268 = sst [smem:[#allocation42_spill]] %s3233_s3 }
   0x5   :  { %3269 = sst [smem:[#allocation43_spill]] %s3234_s4 }
   0x6   :  { %3270 = sst [smem:[#allocation44_spill]] %s3235_s5 }
   0x7   :  { %3271 = sst [smem:[#allocation45_spill]] %s3236_s6 }
   0x8   :  { %3272 = sst [smem:[#allocation46_spill]] %s3237_s7 }
   0x9   :  { %3273 = sst [smem:[#allocation47_spill]] %s3238_s8 }
   0xa   :  { %3274 = sst [smem:[#allocation48_spill]] %s3239_s9 }
   0xb   :  { %3275 = sst [smem:[#allocation49_spill]] %s3240_s10 }
   0xc   :  { %3276 = sst [smem:[#allocation50_spill]] %s3241_s11 }
   0xd   :  { %3277 = sst [smem:[#allocation51_spill]] %s3242_s12 }
   0xe   :  { %3278 = sst [smem:[#allocation52_spill]] %s3258_s28 }
   0xf   :  { %33 = vsyncpa [#allocation3], 0 }
  0x10   :  { %34 = vsyncpa [#allocation6], 0 }
  0x11   :  { %35 = vsyncpa [#allocation9], 0 }
  0x12   :  { %36 = vsyncpa [#allocation12], 0 }
  0x13   :  { %37 = vsyncpa [#allocation15], 0 }
  0x14   :  { %38 = vsyncpa [#allocation18], 0 }
  0x15   :  { %39 = vsyncpa [#allocation21], 0 }
  0x16   :  { %40 = vsyncpa [#allocation24], 0 }
  0x17   :  { %41 = vsyncpa [#allocation27], 0 }
  0x18   :  { %42 = vsyncpa [#allocation4], 0  ;;  %s3279_s9 = sld [smem:[#allocation42_spill]]  ;;  %s2648_s3 = smov [#allocation5]  }
  0x19   :  { %s66_s6 = sshll.u32 %s2648_s3, 4  ;;  %s3261_s10 = smov 128   ;;  %s67_s6 = int_to_ptr.vmem [resolvable:$true] %s66_s6 }
  0x1a   :  { %s3263_s0 = smov 8   ;;  %s3280_s2 = sld [smem:[#allocation45_spill]] }
  0x1b   :  { %s2651_s12 = smov [#allocation8]   ;;  %s3281_s5 = sld [smem:[#allocation49_spill]] }
  0x1c   :  { %s94_s1 = sshll.u32 %s2651_s12, 4  ;;  %s2652_s3 = smov 64   ;;  %s95_s1 = int_to_ptr.vmem [resolvable:$true] %s94_s1 }
  0x1d   :  { %s2653_s28 = smov 4   ;;  %s2654_s29 = smov [#allocation11]  }
  0x1e   :  { %s64_s30 = sshll.u32 %s3279_s9, 4  ;;  %s2655_s12 = smov [#allocation14]   ;;  %s65_s30 = int_to_ptr.hbm [resolvable:$true] %s64_s30 }
  0x1f   :  { %72 = dma.hbm_to_vmem [thread:$0]  %s65_s30, 512, %s67_s6, [#allocation6], %s3261_s10, %s3261_s10, %s3263_s0  }
  0x20   :  { %s92_s7 = sshll.u32 %s3280_s2, 4  ;;  %s3282_s10 = sld [smem:[#allocation51_spill]]  ;;  %s93_s7 = int_to_ptr.hbm [resolvable:$true] %s92_s7 }
  0x21   :  { %s122_s9 = sshll.u32 %s3281_s5, 4  ;;  %s124_s2 = sshll.u32 %s2654_s29, 4  ;;  %s123_s9 = int_to_ptr.hbm [resolvable:$true] %s122_s9  ;;  %s125_s2 = int_to_ptr.vmem [resolvable:$true] %s124_s2 }
  0x22   :  { %100 = dma.hbm_to_vmem [thread:$0]  %s93_s7, 256, %s95_s1, [#allocation9], %s2652_s3, %s2652_s3, %s2653_s28  }
  0x23   :  { %130 = dma.hbm_to_vmem [thread:$0]  %s123_s9, 256, %s125_s2, [#allocation12], %s2652_s3, %s2652_s3, %s2653_s28  }
  0x24   :  { %s148_s4 = sshll.u32 %s2655_s12, 4  ;;  %s170_s0 = sshll.u32 %s3244_s14, 4  ;;  %s149_s4 = int_to_ptr.vmem [resolvable:$true] %s148_s4  ;;  %s171_s0 = int_to_ptr.hbm [resolvable:$true] %s170_s0 }
  0x25   :  { %s194_s1 = sshll.u32 %s3246_s16, 4  ;;  %s2656_s30 = smov [#allocation17]   ;;  %s195_s1 = int_to_ptr.hbm [resolvable:$true] %s194_s1 }
  0x26   :  { %s146_s11 = sshll.u32 %s3282_s10, 4  ;;  %s172_s6 = sshll.u32 %s2656_s30, 4  ;;  %s147_s11 = int_to_ptr.hbm [resolvable:$true] %s146_s11  ;;  %s173_s6 = int_to_ptr.vmem [resolvable:$true] %s172_s6 }
  0x27   :  { %154 = dma.hbm_to_vmem [thread:$0]  %s147_s11, 256, %s149_s4, [#allocation15], %s2652_s3, %s2652_s3, %s2653_s28  }
  0x28   :  { %178 = dma.hbm_to_vmem [thread:$0]  %s171_s0, 256, %s173_s6, [#allocation18], %s2652_s3, %s2652_s3, %s2653_s28  }
  0x29   :  { %s2657_s9 = smov [#allocation20]   ;;  %s218_s12 = sshll.u32 %s3248_s18, 4  ;;  %s219_s12 = int_to_ptr.hbm [resolvable:$true] %s218_s12 }
  0x2a   :  { %s196_s14 = sshll.u32 %s2657_s9, 4  ;;  %s3283_s4 = sld [smem:[#allocation41_spill]]  ;;  %s197_s14 = int_to_ptr.vmem [resolvable:$true] %s196_s14 }
  0x2b   :  { %202 = dma.hbm_to_vmem [thread:$0]  %s195_s1, 256, %s197_s14, [#allocation21], %s2652_s3, %s2652_s3, %s2653_s28  }
  0x2c   :  { %s2658_s5 = smov [#allocation23]   ;;  %s2659_s0 = smov [#allocation2]  }
  0x2d   :  { %s220_s10 = sshll.u32 %s2658_s5, 4  ;;  %s53_s18 = sshll.u32 %s2659_s0, 4  ;;  %s221_s10 = int_to_ptr.vmem [resolvable:$true] %s220_s10  ;;  %s54_s18 = int_to_ptr.vmem [resolvable:$true] %s53_s18 }
  0x2e   :  { %226 = dma.hbm_to_vmem [thread:$0]  %s219_s12, 256, %s221_s10, [#allocation24], %s2652_s3, %s2652_s3, %s2653_s28  }
  0x2f   :  { %s3284_s6 = sld [smem:[#allocation43_spill]]  ;;  %s3285_s1 = smov 8  }
  0x30   :  { %s51_s8 = sshll.u32 %s3283_s4, 4  ;;  %s3286_s14 = smov 128   ;;  %s52_s8 = int_to_ptr.hbm [resolvable:$true] %s51_s8 }
  0x31   :  { %59 = dma.hbm_to_vmem [thread:$0]  %s52_s8, 256, %s54_s18, [#allocation3], %s3286_s14, %s3286_s14, %s3285_s1  }
  0x32   :  { %s3287_s16 = sld [smem:[#allocation47_spill]]  ;;  %s2660_s4 = smov [#allocation7]  }
  0x33   :  { %s79_s5 = sshll.u32 %s2660_s4, 4  ;;  %s2661_s12 = smov [#allocation10]   ;;  %s80_s5 = int_to_ptr.vmem [resolvable:$true] %s79_s5 }
  0x34   :  { %s109_s10 = sshll.u32 %s2661_s12, 4  ;;  %s3288_s30 = sld [smem:[#allocation50_spill]]  ;;  %s110_s10 = int_to_ptr.vmem [resolvable:$true] %s109_s10 }
  0x35   :  { %s77_s9 = sshll.u32 %s3284_s6, 4  ;;  %s160_s29 = sshll.u32 %s3243_s13, 4  ;;  %s78_s9 = int_to_ptr.hbm [resolvable:$true] %s77_s9  ;;  %s161_s29 = int_to_ptr.hbm [resolvable:$true] %s160_s29 }
  0x36   :  { %85 = dma.hbm_to_vmem [thread:$0]  %s78_s9, 256, %s80_s5, [#allocation6], %s2652_s3, %s2652_s3, %s2653_s28  }
  0x37   :  { %s2662_s2 = smov [#allocation13]   ;;  %s2663_s9 = smov [#allocation16]  }
  0x38   :  { %s107_s11 = sshll.u32 %s3287_s16, 4  ;;  %s138_s16 = sshll.u32 %s2662_s2, 4  ;;  %s108_s11 = int_to_ptr.hbm [resolvable:$true] %s107_s11  ;;  %s139_s16 = int_to_ptr.vmem [resolvable:$true] %s138_s16 }
  0x39   :  { %115 = dma.hbm_to_vmem [thread:$0]  %s108_s11, 256, %s110_s10, [#allocation9], %s2652_s3, %s2652_s3, %s2653_s28  }
  0x3a   :  { %s136_s6 = sshll.u32 %s3288_s30, 4  ;;  %s162_s4 = sshll.u32 %s2663_s9, 4  ;;  %s137_s6 = int_to_ptr.hbm [resolvable:$true] %s136_s6  ;;  %s163_s4 = int_to_ptr.vmem [resolvable:$true] %s162_s4 }
  0x3b   :  { %141 = dma.hbm_to_vmem [thread:$0]  %s137_s6, 16, %s139_s16, [#allocation12]  }
  0x3c   :  { %s184_s0 = sshll.u32 %s3245_s15, 4  ;;  %s208_s3 = sshll.u32 %s3247_s17, 4  ;;  %s185_s0 = int_to_ptr.hbm [resolvable:$true] %s184_s0  ;;  %s209_s3 = int_to_ptr.hbm [resolvable:$true] %s208_s3 }
  0x3d   :  { %165 = dma.hbm_to_vmem [thread:$0]  %s161_s29, 16, %s163_s4, [#allocation15]  }
  0x3e   :  { %s2664_s11 = smov [#allocation19]   ;;  %s2665_s10 = smov [#allocation22]  }
  0x3f   :  { %s186_s13 = sshll.u32 %s2664_s11, 4  ;;  %s210_s30 = sshll.u32 %s2665_s10, 4  ;;  %s187_s13 = int_to_ptr.vmem [resolvable:$true] %s186_s13  ;;  %s211_s30 = int_to_ptr.vmem [resolvable:$true] %s210_s30 }
  0x40   :  { %189 = dma.hbm_to_vmem [thread:$0]  %s185_s0, 16, %s187_s13, [#allocation18]  }
  0x41   :  { %s232_s18 = sshll.u32 %s3249_s19, 4  ;;  %s255_s2 = sshll.u32 %s3256_s26, 4  ;;  %s233_s18 = int_to_ptr.hbm [resolvable:$true] %s232_s18  ;;  %s256_s2 = int_to_ptr.hbm [resolvable:$true] %s255_s2 }
  0x42   :  { %213 = dma.hbm_to_vmem [thread:$0]  %s209_s3, 16, %s211_s30, [#allocation21]  }
  0x43   :  { %s2666_s16 = smov [#allocation25]   ;;  %s2667_s9 = smov [#allocation26]  }
  0x44   :  { %s234_s17 = sshll.u32 %s2666_s16, 4  ;;  %s257_s4 = sshll.u32 %s2667_s9, 4  ;;  %s235_s17 = int_to_ptr.vmem [resolvable:$true] %s234_s17  ;;  %s258_s4 = int_to_ptr.vmem [resolvable:$true] %s257_s4 }
  0x45   :  { %237 = dma.hbm_to_vmem [thread:$0]  %s233_s18, 16, %s235_s17, [#allocation24]  }
  0x46   :  { %260 = dma.hbm_to_vmem [thread:$0]  %s256_s2, 16, %s258_s4, [#allocation27]  }
  0x47   :  { %2628 = dma.done.wait [#allocation3], 256  }
  0x48   :  { %2629 = vsyncadd [#allocation3], 4294967040 }
  0x49   :  { %2630 = dma.done.wait [#allocation6], 768  }
  0x4a   :  { %2631 = vsyncadd [#allocation6], 4294966528 }
  0x4b   :  { %2632 = dma.done.wait [#allocation9], 512  }
  0x4c   :  { %2633 = vsyncadd [#allocation9], 4294966784 }
  0x4d   :  { %2634 = dma.done.wait [#allocation12], 272  }
  0x4e   :  { %2635 = vsyncadd [#allocation12], 4294967024 }
  0x4f   :  { %2636 = dma.done.wait [#allocation15], 272  }
  0x50   :  { %2637 = vsyncadd [#allocation15], 4294967024 }
  0x51   :  { %2638 = dma.done.wait [#allocation18], 272  }
  0x52   :  { %2639 = vsyncadd [#allocation18], 4294967024 }
  0x53   :  { %2640 = dma.done.wait [#allocation21], 272  }
  0x54   :  { %2641 = vsyncadd [#allocation21], 4294967024 }
  0x55   :  { %2642 = dma.done.wait [#allocation24], 272  }
  0x56   :  { %2643 = vsyncadd [#allocation24], 4294967024 }
  0x57   :  { %2644 = dma.done.wait [#allocation27], 16  }
  0x58   :  { %2645 = vsyncadd [#allocation27], 4294967280  ;;  %v2086_v0 = vld [vmem:[#allocation7 + $0x8] sm:$0xff]  ;;  %s3289_s5 = sld [smem:[#allocation39_spill]]  ;;  %v2909_v3 = vld [vmem:[#allocation2] sm:$0xff]  ;;  %vm363_vm0 = vcmask 261120  }
  0x59   :  { %v2911_v4 = vld [vmem:[#allocation2 + $0x8] sm:$0xff]  ;;  %373 = vmatpush.bf16.msra.mxu0 %v2086_v0  ;;  %v2085_v5 = vld [vmem:[#allocation7] sm:$0xff]  ;;  %s3290_s3 = sld [smem:[#allocation44_spill]]  ;;  %s2668_s11 = smov 120   ;;  %v2087_v21 = vld [vmem:[#allocation8] sm:$0xff]  ;;  %vm428_vm1 = vcmask 64512  }
  0x5a   :  { %s2669_s13 = smov 96   ;;  %s2670_s10 = smov 88   ;;  %v2088_v20 = vld [vmem:[#allocation8 + $0x8] sm:$0xff]  ;;  %vm499_vm2 = vcmask 1043456   ;;  %vm1232_vm9 = vcmask 130048  }
  0x5b   :  { %411 = vmatpush.bf16.msra.mxu1 %v2088_v20  ;;  %s3291_s8 = sld [smem:[#allocation46_spill]]  ;;  %s2671_s18 = smov 80  }
  0x5c   :  { %s2672_s15 = smov 112   ;;  %s2673_s29 = smov 72  }
  0x5d   :  { %374 = vmatpush.bf16.msra.mxu0 %v2085_v5  ;;  %s2674_s2 = smov 104   ;;  %s3292_s9 = sld [smem:[#allocation48_spill]] }
  0x5e   :  { %v2902_v1 = vld [vmem:[%s3289_s5] sm:$0xff]  ;;  %v2907_v2 = vld [vmem:[%s3289_s5 + $0x8] sm:$0xff]  ;;  %s3293_s26 = sld [smem:[#allocation40_spill]]  ;;  %s2675_s19 = smov [#allocation28]  }
  0x5f   :  { %v340_v6 = vadd.f32 %v2909_v3, %v2902_v1  ;;  %v341_v7 = vadd.f32 %v2911_v4, %v2907_v2  ;;  %v2129_v9 = vld [vmem:[%s3290_s3] ss:$0 sm:$0xff]  ;;  %412 = vmatpush.bf16.msra.mxu1 %v2087_v21  ;;  %v381_v22 = vpack.c.bf16 %v2907_v2, %v2902_v1  ;;  %s3294_s0 = sld [smem:[#allocation52_spill]] }
  0x61   :  { %v342_v8 = vpack.c.bf16 %v341_v7, %v340_v6  ;;  %v2130_v35 = vld [vmem:[%s3291_s8] ss:$0 sm:$0xff] }
  0x62   :  { %1989 = vmatmul.msk.bf16.vlgmr.msra.gmra.mxu1 %vm363_vm0, %v381_v22 }
  0x63   :  { %1980 = vmatmul.msk.bf16.vlgmr.msra.gmra.mxu0 %vm363_vm0, %v342_v8 }
  0x65   :  { %s1951_s7 = sshll.u32 %s3294_s0, 4  ;;  %s1952_s7 = int_to_ptr.hbm [resolvable:$true] %s1951_s7 }
  0xdf   :  { %v414_v36 = vpop.f32.mrf.mxu1 }
  0xe0   :  { %v376_v10 = vpop.f32.mrf.mxu0  ;;  %v415_v37 = vadd.f32 %v2130_v35, %v414_v36 }
  0xe1   :  { %v377_v11 = vadd.f32 %v2129_v9, %v376_v10 }
  0xe2   :  { %v421_v40 = vpack.c.bf16 %v415_v37, %v415_v37 }
  0xe3   :  { %v419_v12 = vpack.c.bf16 %v377_v11, %v377_v11 }
  0xe4   :  { %v608_v41 = vunpack.c.l.b16 %v421_v40  ;;  %v501_v56 = vsel %vm499_vm2, %v421_v40, 0 }
  0xe5   :  { %v424_v13 = vunpack.c.l.b16 %v419_v12  ;;  %510 = vmatpush.bf16.msrb.mxu0 %v501_v56 }
  0xe6   :  { %v2949_v45 = vpack.c.b16 %v608_v41, %v608_v41 }
  0xe7   :  { %v2921_v14 = vpack.c.b16 %v424_v13, %v424_v13  ;;  %v416_v51 = vpop.f32.mrf.mxu1 }
  0xe8   :  { %v378_v15 = vpop.f32.mrf.mxu0  ;;  %v417_v52 = vadd.f32 %v2130_v35, %v416_v51  ;;  %v657_v35 = vld [vmem:[#allocation10 + $0x4] sm:$0xf] }
  0xe9   :  { %v379_v16 = vadd.f32 %v2129_v9, %v378_v15  ;;  %537 = vrot.lane.b32.xlu1 %v2921_v14, %s2668_s11  ;;  %426 = vrot.lane.b32.xlu0 %v2921_v14, %s2669_s13  ;;  %v662_v36 = vsel %vm499_vm2, %v657_v35, 0 }
  0xea   :  { %v422_v53 = vpack.c.bf16 %v417_v52, %v417_v52 }
  0xeb   :  { %v420_v17 = vpack.c.bf16 %v379_v16, %v379_v16 }
  0xec   :  { %v632_v54 = vunpack.c.l.b16 %v422_v53  ;;  %v520_v57 = vsel %vm499_vm2, %v422_v53, 0 }
  0xed   :  { %v449_v18 = vunpack.c.l.b16 %v420_v17  ;;  %529 = vmatpush.bf16.msrb.mxu1 %v520_v57 }
  0xee   :  { %v2957_v55 = vpack.c.b16 %v632_v54, %v632_v54 }
  0xef   :  { %v2926_v19 = vpack.c.b16 %v449_v18, %v449_v18 }
  0xf1   :  { %562 = vrot.lane.b32.xlu2 %v2926_v19, %s2670_s10  ;;  %451 = vrot.lane.b32.xlu1 %v2926_v19, %s2669_s13 }
  0xf2   :  { %539 = vrot.lane.b32.xlu0 %v2921_v14, %s2670_s10 }
  0xf9   :  { %560 = vrot.lane.b32.xlu2 %v2926_v19, %s2668_s11 }
 0x14b   :  { %v563_v26 = vpop.permute.xlu2 %562 }
 0x14c   :  { %v568_v31 = vsel %vm428_vm1, %v563_v26, 0 }
 0x153   :  { %v561_v32 = vpop.permute.xlu2 %560 }
 0x15b   :  { %v538_v23 = vpop.permute.xlu1 %537  ;;  %v427_v24 = vpop.permute.xlu0 %426 }
 0x15c   :  { %v433_v25 = vsel %vm428_vm1, %v427_v24, 0 }
 0x15d   :  { %442 = vmatpush.bf16.xpose.msra.mxu2 %v433_v25 }
 0x163   :  { %v452_v27 = vpop.permute.xlu1 %451 }
 0x164   :  { %v540_v28 = vpop.permute.xlu0 %539  ;;  %1990 = vmatmul.msk.bf16.vlgmr.msra.gmra.mxu2 %vm428_vm1, %v419_v12  ;;  %v457_v29 = vsel %vm428_vm1, %v452_v27, 0 }
 0x165   :  { %466 = vmatpush.bf16.xpose.msra.mxu3 %v457_v29  ;;  %v545_v30 = vsel %vm428_vm1, %v540_v28, 0 }
 0x166   :  { %554 = vmatpush.bf16.xpose.msrb.mxu2 %v545_v30 }
 0x16c   :  { %1991 = vmatmul.msk.bf16.vlgmr.msra.gmra.mxu3 %vm428_vm1, %v420_v17 }
 0x16d   :  { %577 = vmatpush.bf16.xpose.msrb.mxu3 %v568_v31 }
 0x16e   :  { %671 = vmatpush.bf16.msra.mxu2 %v662_v36 }
 0x174   :  { %1994 = vmatmul.msk.bf16.vlgmr.msrb.gmra.mxu2 %vm428_vm1, %v538_v23 }
 0x17c   :  { %1995 = vmatmul.msk.bf16.vlgmr.msrb.gmra.mxu3 %vm428_vm1, %v561_v32 }
 0x1e7   :  { %v444_v33 = vpop.f32.mrf.mxu2 }
 0x1e8   :  { %v472_v34 = vsel %vm428_vm1, %v444_v33, -inf }
 0x1e9   :  { %473 = vmax.xlane.f32.xlu0 %v472_v34 }
 0x1ef   :  { %v446_v38 = vpop.f32.mrf.mxu2  ;;  %v468_v39 = vpop.f32.mrf.mxu3 }
 0x1f0   :  { %v475_v49 = vsel %vm428_vm1, %v468_v39, -inf }
 0x1f7   :  { %v470_v42 = vpop.f32.mrf.mxu3  ;;  %v556_v43 = vpop.f32.mrf.mxu2 }
 0x1f8   :  { %v583_v44 = vsel %vm428_vm1, %v556_v43, -inf }
 0x1f9   :  { %584 = vmax.xlane.f32.xlu1 %v583_v44 }
 0x1fd   :  { %610 = vrot.lane.b32.xlu0 %v2949_v45, %s2668_s11 }
 0x1ff   :  { %v558_v46 = vpop.f32.mrf.mxu2  ;;  %v579_v47 = vpop.f32.mrf.mxu3 }
 0x200   :  { %v586_v50 = vsel %vm428_vm1, %v579_v47, -inf }
 0x207   :  { %v581_v48 = vpop.f32.mrf.mxu3 }
 0x212   :  { %700 = vrot.lane.b32.xlu1 %v2921_v14, %s2671_s18 }
 0x227   :  { %476 = vmax.xlane.f32.xlu0 %v475_v49  ;;  %v536_v49 = vld [vmem:[#allocation10] sm:$0xf] }
 0x23c   :  { %587 = vmax.xlane.f32.xlu1 %v586_v50  ;;  %v682_v50 = vsel %vm499_vm2, %v536_v49, 0 }
 0x23d   :  { %691 = vmatpush.bf16.msra.mxu3 %v682_v50 }
 0x255   :  { %634 = vrot.lane.b32.xlu1 %v2957_v55, %s2668_s11 }
 0x25c   :  { %v474_v58 = vpop.xlane.xlu0 %473 }
 0x25d   :  { %v478_v59 = vsub.f32 %v444_v33, %v474_v58 }
 0x25f   :  { %v480_v60 = vmul.f32 1.442695, %v478_v59 }
 0x261   :  { %2144 = vpow2.f32 %v480_v60 }
 0x267   :  { %v2145_v61 = vpop.eup %2144 }
 0x268   :  { %v484_v62 = vsel %vm428_vm1, %v2145_v61, 0.0 }
 0x269   :  { %485 = vadd.xlane.f32.xlu2 %v484_v62 }
 0x26c   :  { %v585_v63 = vpop.xlane.xlu1 %584 }
 0x26d   :  { %v589_v0 = vsub.f32 %v556_v43, %v585_v63 }
 0x26f   :  { %v591_v5 = vmul.f32 1.442695, %v589_v0  ;;  %v611_v6 = vpop.permute.xlu0 %610 }
 0x270   :  { %v616_v7 = vsel %vm499_vm2, %v611_v6, 0 }
 0x271   :  { %2146 = vpow2.f32 %v591_v5  ;;  %625 = vmatpush.bf16.msra.mxu0 %v616_v7 }
 0x277   :  { %v2147_v8 = vpop.eup %2146 }
 0x278   :  { %v595_v9 = vsel %vm428_vm1, %v2147_v8, 0.0 }
 0x279   :  { %596 = vadd.xlane.f32.xlu2 %v595_v9 }
 0x284   :  { %v701_v11 = vpop.permute.xlu1 %700 }
 0x285   :  { %v706_v29 = vsel %vm428_vm1, %v701_v11, 0 }
 0x291   :  { %698 = vrot.lane.b32.xlu2 %v2921_v14, %s2672_s15 }
 0x29a   :  { %v477_v10 = vpop.xlane.xlu0 %476 }
 0x29b   :  { %v479_v12 = vsub.f32 %v468_v39, %v477_v10 }
 0x29d   :  { %v482_v13 = vmul.f32 1.442695, %v479_v12 }
 0x29f   :  { %2148 = vpow2.f32 %v482_v13 }
 0x2a5   :  { %v2149_v18 = vpop.eup %2148 }
 0x2a6   :  { %v487_v20 = vsel %vm428_vm1, %v2149_v18, 0.0 }
 0x2af   :  { %v588_v15 = vpop.xlane.xlu1 %587 }
 0x2b0   :  { %v590_v16 = vsub.f32 %v579_v47, %v588_v15 }
 0x2b2   :  { %v593_v17 = vmul.f32 1.442695, %v590_v16 }
 0x2b4   :  { %2150 = vpow2.f32 %v593_v17 }
 0x2ba   :  { %v2151_v21 = vpop.eup %2150  ;;  %488 = vadd.xlane.f32.xlu2 %v487_v20 }
 0x2bb   :  { %v598_v22 = vsel %vm428_vm1, %v2151_v21, 0.0 }
 0x2bc   :  { %599 = vadd.xlane.f32.xlu0 %v598_v22 }
 0x2c7   :  { %v635_v23 = vpop.permute.xlu1 %634 }
 0x2c8   :  { %v640_v24 = vsel %vm499_vm2, %v635_v23, 0 }
 0x2c9   :  { %649 = vmatpush.bf16.msra.mxu1 %v640_v24 }
 0x2d0   :  { %723 = vrot.lane.b32.xlu0 %v2926_v19, %s2671_s18 }
 0x2d2   :  { %721 = vrot.lane.b32.xlu2 %v2926_v19, %s2672_s15 }
 0x2da   :  { %768 = vrot.lane.b32.xlu2 %v2949_v45, %s2672_s15 }
 0x2dc   :  { %v486_v25 = vpop.xlane.xlu2 %485 }
 0x2dd   :  { %2152 = vrcp.f32 %v486_v25 }
 0x2e2   :  { %837 = vrot.lane.b32.xlu2 %v2921_v14, %s2673_s29 }
 0x2e3   :  { %v2153_v26 = vpop.eup %2152 }
 0x2e4   :  { %v492_v27 = vmul.f32 %v2153_v26, %v2145_v61 }
 0x2e6   :  { %v494_v28 = vpack.c.bf16 %v492_v27, %v492_v27 }
 0x2e8   :  { %1992 = vmatmul.msk.bf16.vlgmr.msrb.gmra.mxu0 %vm428_vm1, %v494_v28 }
 0x2e9   :  { %715 = vmatpush.bf16.xpose.msrb.mxu0 %v706_v29 }
 0x2ea   :  { %860 = vrot.lane.b32.xlu2 %v2926_v19, %s2673_s29 }
 0x2ec   :  { %v597_v30 = vpop.xlane.xlu2 %596 }
 0x2ed   :  { %2154 = vrcp.f32 %v597_v30 }
 0x2f2   :  { %835 = vrot.lane.b32.xlu2 %v2921_v14, %s2674_s2 }
 0x2f3   :  { %v2155_v31 = vpop.eup %2154 }
 0x2f4   :  { %v603_v32 = vmul.f32 %v2155_v31, %v2147_v8  ;;  %v699_v34 = vpop.permute.xlu2 %698 }
 0x2f6   :  { %v605_v33 = vpack.c.bf16 %v603_v32, %v603_v32 }
 0x2f8   :  { %1996 = vmatmul.msk.bf16.vlgmr.msra.gmra.mxu0 %vm428_vm1, %v605_v33 }
 0x2fa   :  { %858 = vrot.lane.b32.xlu2 %v2926_v19, %s2674_s2 }
 0x302   :  { %789 = vrot.lane.b32.xlu2 %v2957_v55, %s2672_s15 }
 0x308   :  { %2000 = vmatmul.msk.bf16.vlgmr.msrb.gmra.mxu0 %vm428_vm1, %v699_v34 }
 0x32d   :  { %v489_v37 = vpop.xlane.xlu2 %488 }
 0x32e   :  { %2156 = vrcp.f32 %v489_v37 }
 0x32f   :  { %v600_v40 = vpop.xlane.xlu0 %599 }
 0x330   :  { %2158 = vrcp.f32 %v600_v40 }
 0x334   :  { %v2157_v14 = vpop.eup %2156 }
 0x335   :  { %v493_v38 = vmul.f32 %v2157_v14, %v2149_v18  ;;  %v722_v39 = vpop.permute.xlu2 %721 }
 0x336   :  { %v2159_v43 = vpop.eup %2158 }
 0x337   :  { %v495_v41 = vpack.c.bf16 %v493_v38, %v493_v38  ;;  %v604_v46 = vmul.f32 %v2159_v43, %v2151_v21 }
 0x339   :  { %1993 = vmatmul.msk.bf16.vlgmr.msrb.gmra.mxu1 %vm428_vm1, %v495_v41  ;;  %v606_v51 = vpack.c.bf16 %v604_v46, %v604_v46 }
 0x33d   :  { %v769_v19 = vpop.permute.xlu2 %768 }
 0x33e   :  { %v774_v42 = vsel %vm499_vm2, %v769_v19, 0 }
 0x33f   :  { %783 = vmatpush.bf16.msrb.mxu2 %v774_v42 }
 0x342   :  { %v724_v44 = vpop.permute.xlu0 %723 }
 0x343   :  { %v729_v47 = vsel %vm428_vm1, %v724_v44, 0 }
 0x344   :  { %738 = vmatpush.bf16.xpose.msrb.mxu1 %v729_v47 }
 0x345   :  { %v838_v48 = vpop.permute.xlu2 %837 }
 0x346   :  { %v843_v52 = vsel %vm428_vm1, %v838_v48, 0 }
 0x349   :  { %1997 = vmatmul.msk.bf16.vlgmr.msra.gmra.mxu1 %vm428_vm1, %v606_v51 }
 0x34c   :  { %852 = vmatpush.bf16.xpose.msra.mxu1 %v843_v52  ;;  %v812_v52 = vld [vmem:[#allocation10 + $0x8] sm:$0xf] }
 0x34d   :  { %v861_v53 = vpop.permute.xlu2 %860 }
 0x34e   :  { %v866_v11 = vsel %vm428_vm1, %v861_v53, 0  ;;  %v817_v53 = vsel %vm499_vm2, %v812_v52, 0 }
 0x34f   :  { %826 = vmatpush.bf16.msra.mxu0 %v817_v53 }
 0x355   :  { %v836_v54 = vpop.permute.xlu2 %835 }
 0x359   :  { %2001 = vmatmul.msk.bf16.vlgmr.msrb.gmra.mxu1 %vm428_vm1, %v722_v39 }
 0x35d   :  { %v859_v56 = vpop.permute.xlu2 %858 }
 0x365   :  { %v512_v57 = vpop.f32.mrf.mxu0  ;;  %v790_v58 = vpop.permute.xlu2 %789 }
 0x366   :  { %v795_v59 = vsel %vm499_vm2, %v790_v58, 0 }
 0x367   :  { %804 = vmatpush.bf16.msrb.mxu3 %v795_v59 }
 0x369   :  { %2005 = vmatmul.msk.bf16.vlgmr.msra.gmra.mxu1 %vm428_vm1, %v836_v54 }
 0x36d   :  { %v514_v60 = vpop.f32.mrf.mxu0 }
 0x375   :  { %v627_v61 = vpop.f32.mrf.mxu0 }
 0x37d   :  { %v629_v62 = vpop.f32.mrf.mxu0 }
 0x385   :  { %v717_v63 = vpop.f32.mrf.mxu0 }
 0x386   :  { %v744_v0 = vsel %vm428_vm1, %v717_v63, -inf }
 0x387   :  { %745 = vmax.xlane.f32.xlu0 %v744_v0 }
 0x38d   :  { %v719_v5 = vpop.f32.mrf.mxu0 }
 0x3b6   :  { %v531_v6 = vpop.f32.mrf.mxu1 }
 0x3b7   :  { %v535_v7 = vpack.c.bf16 %v531_v6, %v512_v57 }
 0x3b9   :  { %1999 = vmatmul.msk.bf16.vlgmr.msra.gmra.mxu3 %vm428_vm1, %v535_v7 }
 0x3be   :  { %v533_v8 = vpop.f32.mrf.mxu1 }
 0x3c6   :  { %v651_v9 = vpop.f32.mrf.mxu1 }
 0x3c7   :  { %v655_v10 = vpack.c.bf16 %v651_v9, %v627_v61 }
 0x3c9   :  { %1998 = vmatmul.msk.bf16.vlgmr.msra.gmra.mxu2 %vm428_vm1, %v655_v10 }
 0x3ca   :  { %875 = vmatpush.bf16.xpose.msra.mxu2 %v866_v11 }
 0x3ce   :  { %v653_v12 = vpop.f32.mrf.mxu1 }
 0x3d6   :  { %v740_v13 = vpop.f32.mrf.mxu1 }
 0x3d7   :  { %v747_v15 = vsel %vm428_vm1, %v740_v13, -inf }
 0x3d8   :  { %748 = vmax.xlane.f32.xlu0 %v747_v15 }
 0x3de   :  { %v742_v16 = vpop.f32.mrf.mxu1 }
 0x3e6   :  { %v854_v17 = vpop.f32.mrf.mxu1 }
 0x3e7   :  { %v881_v18 = vsel %vm428_vm1, %v854_v17, -inf }
 0x3e8   :  { %882 = vmax.xlane.f32.xlu0 %v881_v18 }
 0x3ee   :  { %v856_v20 = vpop.f32.mrf.mxu1 }
 0x3fa   :  { %v746_v21 = vpop.xlane.xlu0 %745 }
 0x3fb   :  { %v750_v22 = vsub.f32 %v717_v63, %v746_v21  ;;  %v949_v21 = vld [vmem:[#allocation10 + $0xc] sm:$0xf] }
 0x3fd   :  { %v752_v23 = vmul.f32 1.442695, %v750_v22  ;;  %v954_v22 = vsel %vm499_vm2, %v949_v21, 0 }
 0x3fe   :  { %963 = vmatpush.bf16.msrb.mxu1 %v954_v22 }
 0x3ff   :  { %2160 = vpow2.f32 %v752_v23 }
 0x405   :  { %v2161_v24 = vpop.eup %2160 }
 0x406   :  { %v756_v25 = vsel %vm428_vm1, %v2161_v24, 0.0 }
 0x407   :  { %757 = vadd.xlane.f32.xlu1 %v756_v25 }
 0x43c   :  { %v693_v27 = vpop.f32.mrf.mxu3 }
 0x444   :  { %v695_v54 = vpop.f32.mrf.mxu3 }
 0x44b   :  { %v749_v26 = vpop.xlane.xlu0 %748 }
 0x44c   :  { %v751_v28 = vsub.f32 %v740_v13, %v749_v26  ;;  %v673_v29 = vpop.f32.mrf.mxu2  ;;  %v2131_v26 = vld [vmem:[%s3292_s9] ss:$0 sm:$0xff] }
 0x44d   :  { %v694_v30 = vadd.f32 %v693_v27, %v673_v29 }
 0x44e   :  { %v754_v31 = vmul.f32 1.442695, %v751_v28 }
 0x450   :  { %2162 = vpow2.f32 %v754_v31 }
 0x454   :  { %v675_v46 = vpop.f32.mrf.mxu2 }
 0x456   :  { %v2163_v32 = vpop.eup %2162 }
 0x457   :  { %v759_v33 = vsel %vm428_vm1, %v2163_v32, 0.0 }
 0x458   :  { %760 = vadd.xlane.f32.xlu1 %v759_v33 }
 0x45b   :  { %v883_v34 = vpop.xlane.xlu0 %882 }
 0x45c   :  { %v887_v35 = vsub.f32 %v854_v17, %v883_v34 }
 0x45e   :  { %v889_v36 = vmul.f32 1.442695, %v887_v35 }
 0x460   :  { %2164 = vpow2.f32 %v889_v36 }
 0x466   :  { %v2165_v37 = vpop.eup %2164 }
 0x467   :  { %v893_v14 = vsel %vm428_vm1, %v2165_v37, 0.0 }
 0x468   :  { %894 = vadd.xlane.f32.xlu2 %v893_v14 }
 0x47a   :  { %v758_v38 = vpop.xlane.xlu1 %757 }
 0x47b   :  { %2166 = vrcp.f32 %v758_v38  ;;  %v2092_v38 = vld [vmem:[#allocation14 + $0x8] sm:$0xff] }
 0x481   :  { %v2167_v39 = vpop.eup %2166 }
 0x482   :  { %v764_v40 = vmul.f32 %v2167_v39, %v2161_v24  ;;  %v3035_v39 = vld [vmem:[%s3293_s26] sm:$0xff] }
 0x484   :  { %v766_v41 = vpack.c.bf16 %v764_v40, %v764_v40  ;;  %v336_v40 = vld [vmem:[#allocation5] sm:$0xff] }
 0x486   :  { %2002 = vmatmul.msk.bf16.vlgmr.msrb.gmra.mxu2 %vm428_vm1, %v766_v41  ;;  %v337_v41 = vld [vmem:[#allocation5 + $0x8] sm:$0xff] }
 0x496   :  { %2006 = vmatmul.msk.bf16.vlgmr.msra.gmra.mxu2 %vm428_vm1, %v859_v56 }
 0x4cb   :  { %v761_v19 = vpop.xlane.xlu1 %760 }
 0x4cc   :  { %2168 = vrcp.f32 %v761_v19  ;;  %v2091_v19 = vld [vmem:[#allocation14] sm:$0xff] }
 0x4d2   :  { %v2169_v42 = vpop.eup %2168 }
 0x4d3   :  { %v765_v43 = vmul.f32 %v2169_v42, %v2163_v32 }
 0x4d5   :  { %v767_v44 = vpack.c.bf16 %v765_v43, %v765_v43 }
 0x4d7   :  { %2003 = vmatmul.msk.bf16.vlgmr.msrb.gmra.mxu3 %vm428_vm1, %v767_v44 }
 0x4db   :  { %v895_v63 = vpop.xlane.xlu2 %894 }
 0x509   :  { %v785_v47 = vpop.f32.mrf.mxu2 }
 0x511   :  { %v787_v48 = vpop.f32.mrf.mxu2 }
 0x519   :  { %v877_v49 = vpop.f32.mrf.mxu2 }
 0x51a   :  { %v884_v50 = vsel %vm428_vm1, %v877_v49, -inf }
 0x51b   :  { %885 = vmax.xlane.f32.xlu1 %v884_v50 }
 0x521   :  { %v879_v51 = vpop.f32.mrf.mxu2 }
 0x534   :  { %905 = vrot.lane.b32.xlu1 %v2949_v45, %s2674_s2 }
 0x55a   :  { %v806_v56 = vpop.f32.mrf.mxu3 }
 0x55b   :  { %v810_v57 = vpack.c.bf16 %v806_v56, %v785_v47  ;;  %v3050_v56 = vld [vmem:[%s3293_s26 + $0x10] sm:$0xff] }
 0x55d   :  { %2004 = vmatmul.msk.bf16.vlgmr.msra.gmra.mxu0 %vm428_vm1, %v810_v57  ;;  %v3055_v57 = vld [vmem:[%s3293_s26 + $0x18] sm:$0xff] }
 0x562   :  { %v808_v58 = vpop.f32.mrf.mxu3 }
 0x563   :  { %v338_v58 = vld [vmem:[#allocation5 + $0x10] sm:$0xff] }
 0x58e   :  { %v886_v59 = vpop.xlane.xlu1 %885 }
 0x58f   :  { %v888_v60 = vsub.f32 %v877_v49, %v886_v59  ;;  %v339_v59 = vld [vmem:[#allocation5 + $0x18] sm:$0xff] }
 0x591   :  { %v891_v61 = vmul.f32 1.442695, %v888_v60  ;;  %v1078_v60 = vadd.f32 %v338_v58, %v3050_v56 }
 0x593   :  { %2170 = vpow2.f32 %v891_v61  ;;  %v1079_v61 = vadd.f32 %v339_v59, %v3055_v57 }
 0x594   :  { %2172 = vrcp.f32 %v895_v63 }
 0x599   :  { %v2171_v62 = vpop.eup %2170 }
 0x59a   :  { %v896_v0 = vsel %vm428_vm1, %v2171_v62, 0.0  ;;  %v2173_v45 = vpop.eup %2172 }
 0x59b   :  { %897 = vadd.xlane.f32.xlu0 %v896_v0  ;;  %v901_v5 = vmul.f32 %v2173_v45, %v2165_v37  ;;  %v2090_v45 = vld [vmem:[#allocation11 + $0x8] sm:$0xff] }
 0x59c   :  { %1068 = vmatpush.bf16.msrb.mxu2 %v2090_v45 }
 0x59d   :  { %v903_v8 = vpack.c.bf16 %v901_v5, %v901_v5 }
 0x5a6   :  { %v906_v6 = vpop.permute.xlu1 %905 }
 0x5a7   :  { %v911_v7 = vsel %vm499_vm2, %v906_v6, 0  ;;  %v2089_v6 = vld [vmem:[#allocation11] sm:$0xff] }
 0x5a8   :  { %920 = vmatpush.bf16.msra.mxu3 %v911_v7  ;;  %1069 = vmatpush.bf16.msrb.mxu2 %v2089_v6  ;;  %v1128_v6 = vpack.c.bf16 %v3055_v57, %v3050_v56 }
 0x5ab   :  { %2007 = vmatmul.msk.bf16.vlgmr.msra.gmra.mxu3 %vm428_vm1, %v903_v8 }
 0x5ac   :  { %1114 = vmatpush.bf16.msrb.mxu3 %v2092_v38 }
 0x5af   :  { %926 = vrot.lane.b32.xlu0 %v2957_v55, %s2674_s2 }
 0x5b0   :  { %1115 = vmatpush.bf16.msrb.mxu3 %v2091_v19 }
 0x5da   :  { %v828_v9 = vpop.f32.mrf.mxu0 }
 0x5db   :  { %v833_v10 = vadd.f32 %v828_v9, %v694_v30  ;;  %v696_v30 = vadd.f32 %v695_v54, %v675_v46 }
 0x5e2   :  { %v830_v55 = vpop.f32.mrf.mxu0 }
 0x5e3   :  { %v834_v32 = vadd.f32 %v830_v55, %v696_v30 }
 0x60e   :  { %v898_v11 = vpop.xlane.xlu0 %897 }
 0x60f   :  { %2174 = vrcp.f32 %v898_v11 }
 0x615   :  { %v2175_v12 = vpop.eup %2174 }
 0x616   :  { %v902_v13 = vmul.f32 %v2175_v12, %v2171_v62  ;;  %v1081_v62 = vpack.c.bf16 %v1079_v61, %v1078_v60  ;;  %v2093_v60 = vld [vmem:[#allocation17] sm:$0xff] }
 0x618   :  { %v904_v17 = vpack.c.bf16 %v902_v13, %v902_v13 }
 0x621   :  { %v927_v15 = vpop.permute.xlu0 %926 }
 0x622   :  { %v932_v16 = vsel %vm499_vm2, %v927_v15, 0 }
 0x623   :  { %941 = vmatpush.bf16.msrb.mxu0 %v932_v16 }
 0x626   :  { %2008 = vmatmul.msk.bf16.vlgmr.msrb.gmra.mxu0 %vm428_vm1, %v904_v17 }
 0x62e   :  { %v922_v18 = vpop.f32.mrf.mxu3 }
 0x636   :  { %v924_v20 = vpop.f32.mrf.mxu3 }
 0x6a3   :  { %v943_v23 = vpop.f32.mrf.mxu0 }
 0x6a4   :  { %v947_v24 = vpack.c.bf16 %v943_v23, %v922_v18 }
 0x6a6   :  { %2009 = vmatmul.msk.bf16.vlgmr.msrb.gmra.mxu1 %vm428_vm1, %v947_v24 }
 0x6ab   :  { %v945_v25 = vpop.f32.mrf.mxu0 }
 0x723   :  { %v965_v27 = vpop.f32.mrf.mxu1 }
 0x724   :  { %v970_v28 = vadd.f32 %v965_v27, %v833_v10  ;;  %v2134_v10 = vld [vmem:[#allocation16] ss:$0 sm:$0xff] }
 0x726   :  { %v976_v29 = vadd.f32 %v2131_v26, %v970_v28 }
 0x728   :  { %v978_v31 = vadd.f32 %v976_v29, %v2902_v1  ;;  %v3040_v1 = vld [vmem:[%s3293_s26 + $0x8] sm:$0xff]  ;;  %s1949_s26 = sshll.u32 %s2675_s19, 4  ;;  %s1950_s26 = int_to_ptr.vmem [resolvable:$true] %s1949_s26 }
 0x729   :  { %v1077_v42 = vadd.f32 %v337_v41, %v3040_v1  ;;  %v1127_v61 = vpack.c.bf16 %v3040_v1, %v3035_v39 }
 0x72a   :  { %v980_v33 = vsel %vm363_vm0, %v978_v31, 0.0 }
 0x72b   :  { %981 = vadd.xlane.f32.xlu1 %v980_v33  ;;  %v967_v34 = vpop.f32.mrf.mxu1 }
 0x72c   :  { %v971_v35 = vadd.f32 %v967_v34, %v834_v32  ;;  %v2132_v32 = vld [vmem:[%s3252_s22] ss:$0 sm:$0xff] }
 0x72e   :  { %v977_v36 = vadd.f32 %v2131_v26, %v971_v35 }
 0x730   :  { %v979_v37 = vadd.f32 %v977_v36, %v2907_v2  ;;  %v1076_v2 = vadd.f32 %v336_v40, %v3035_v39  ;;  %v2133_v36 = vld [vmem:[%s3253_s23] ss:$0 sm:$0xff] }
 0x732   :  { %v983_v14 = vsel %vm363_vm0, %v979_v37, 0.0  ;;  %v1080_v43 = vpack.c.bf16 %v1077_v42, %v1076_v2 }
 0x733   :  { %984 = vadd.xlane.f32.xlu0 %v983_v14 }
 0x734   :  { %2027 = vmatmul.msk.bf16.vlgmr.msrb.gmra.mxu3 %vm363_vm0, %v1080_v43 }
 0x744   :  { %2028 = vmatmul.msk.bf16.gmra.mxu3 %vm363_vm0, %v1081_v62  ;;  %v2135_v62 = vld [vmem:[#allocation13] ss:$0 sm:$0xff] }
 0x79e   :  { %v982_v44 = vpop.xlane.xlu1 %981 }
 0x79f   :  { %v986_v46 = vmul.f32 0.03125, %v982_v44 }
 0x7a1   :  { %v988_v47 = vsub.f32 %v978_v31, %v986_v46 }
 0x7a3   :  { %v990_v48 = vmul.f32 %v988_v47, %v988_v47 }
 0x7a5   :  { %v992_v49 = vsel %vm363_vm0, %v990_v48, 0.0 }
 0x7a6   :  { %993 = vadd.xlane.f32.xlu2 %v992_v49  ;;  %v985_v50 = vpop.xlane.xlu0 %984 }
 0x7a7   :  { %v987_v51 = vmul.f32 0.03125, %v985_v50 }
 0x7a9   :  { %v989_v52 = vsub.f32 %v979_v37, %v987_v51 }
 0x7ab   :  { %v991_v53 = vmul.f32 %v989_v52, %v989_v52 }
 0x7ad   :  { %v995_v54 = vsel %vm363_vm0, %v991_v53, 0.0 }
 0x7ae   :  { %996 = vadd.xlane.f32.xlu2 %v995_v54 }
 0x7b7   :  { %v1117_v9 = vpop.f32.mrf.mxu3 }
 0x7b8   :  { %v1118_v15 = vadd.f32 %v2134_v10, %v1117_v9 }
 0x7ba   :  { %v1176_v18 = vpack.c.bf16 %v1118_v15, %v1118_v15 }
 0x7bc   :  { %v1186_v25 = vunpack.c.l.b16 %v1176_v18 }
 0x7bf   :  { %v1119_v20 = vpop.f32.mrf.mxu3 }
 0x7c0   :  { %v1120_v22 = vadd.f32 %v2134_v10, %v1119_v20 }
 0x7c2   :  { %v1177_v26 = vpack.c.bf16 %v1120_v22, %v1120_v22 }
 0x7c4   :  { %v1187_v29 = vunpack.c.l.b16 %v1177_v26 }
 0x7c6   :  { %v3060_v31 = vpack.c.b16 %v1187_v29, %v1186_v25 }
 0x7c7   :  { %v1122_v46 = vpop.f32.mrf.mxu3 }
 0x7c8   :  { %1308 = vrot.lane.b32.xlu2 %v3060_v31, %s2668_s11  ;;  %v1193_v44 = vsel %vm428_vm1, %v3060_v31, 0 }
 0x7c9   :  { %1202 = vmatpush.bf16.xpose.msra.mxu1 %v1193_v44 }
 0x7cf   :  { %v1124_v49 = vpop.f32.mrf.mxu3 }
 0x7d0   :  { %v1125_v50 = vadd.f32 %v2134_v10, %v1124_v49 }
 0x819   :  { %v994_v63 = vpop.xlane.xlu2 %993 }
 0x81a   :  { %v998_v0 = vmul.f32 0.03125, %v994_v63 }
 0x81c   :  { %v1000_v5 = vadd.f32 1e-05, %v998_v0 }
 0x81e   :  { %2176 = vrsqrt.f32 %v1000_v5  ;;  %vm1008_vm4 = vweird.f32 %v1000_v5 }
 0x821   :  { %v997_v7 = vpop.xlane.xlu2 %996 }
 0x822   :  { %v999_v8 = vmul.f32 0.03125, %v997_v7 }
 0x824   :  { %v2177_v11 = vpop.eup %2176  ;;  %v1001_v12 = vadd.f32 1e-05, %v999_v8 }
 0x825   :  { %v1003_v13 = vmul.f32 %v2177_v11, %v1000_v5  ;;  %vm1009_vm3 = vweird.f32 %v2177_v11 }
 0x826   :  { %2178 = vrsqrt.f32 %v1001_v12  ;;  %vm1010_vm5 = vmor %vm1008_vm4, %vm1009_vm3  ;;  %vm1018_vm7 = vweird.f32 %v1001_v12 }
 0x827   :  { %v1004_v16 = vmul.f32 %v2177_v11, %v1003_v13 }
 0x829   :  { %v1005_v17 = vmul.f32 0.5, %v1004_v16  ;;  %v1309_v58 = vpop.permute.xlu2 %1308 }
 0x82a   :  { %v1314_v59 = vsel %vm428_vm1, %v1309_v58, 0 }
 0x82b   :  { %v1006_v21 = vsub.f32 1.5, %v1005_v17  ;;  %1323 = vmatpush.bf16.xpose.msra.mxu3 %v1314_v59 }
 0x82c   :  { %v2179_v55 = vpop.eup %2178 }
 0x82d   :  { %v1007_v23 = vmul.f32 %v2177_v11, %v1006_v21  ;;  %v1013_v24 = vmul.f32 %v2179_v55, %v1001_v12  ;;  %vm1019_vm6 = vweird.f32 %v2179_v55  ;;  %v2136_v12 = vld [vmem:[#allocation19] ss:$0 sm:$0xff] }
 0x82e   :  { %vm1020_vm8 = vmor %vm1018_vm7, %vm1019_vm6 }
 0x82f   :  { %v1011_v27 = vsel %vm1010_vm5, %v2177_v11, %v1007_v23  ;;  %v1014_v28 = vmul.f32 %v2179_v55, %v1013_v24 }
 0x830   :  { %v1022_v33 = vmul.f32 %v1011_v27, %v988_v47  ;;  %v1123_v47 = vadd.f32 %v2134_v10, %v1122_v46 }
 0x831   :  { %v1015_v30 = vmul.f32 0.5, %v1014_v28 }
 0x832   :  { %v1028_v37 = vmul.f32 %v2132_v32, %v1022_v33  ;;  %v1178_v48 = vpack.c.bf16 %v1123_v47, %v1123_v47 }
 0x833   :  { %v1016_v34 = vsub.f32 1.5, %v1015_v30 }
 0x834   :  { %v3070_v40 = vadd.f32 %v2133_v36, %v1028_v37  ;;  %v1210_v51 = vunpack.c.l.b16 %v1178_v48 }
 0x835   :  { %v1017_v35 = vmul.f32 %v2179_v55, %v1016_v34 }
 0x836   :  { %v1036_v2 = vadd.f32 %v3070_v40, %v2909_v3 }
 0x837   :  { %v1021_v14 = vsel %vm1020_vm8, %v2179_v55, %v1017_v35 }
 0x838   :  { %v1023_v38 = vmul.f32 %v1021_v14, %v989_v52  ;;  %v1179_v52 = vpack.c.bf16 %v1125_v50, %v1125_v50 }
 0x83a   :  { %v1029_v41 = vmul.f32 %v2132_v32, %v1023_v38  ;;  %v1211_v53 = vunpack.c.l.b16 %v1179_v52 }
 0x83c   :  { %v3072_v19 = vadd.f32 %v2133_v36, %v1029_v41  ;;  %v3081_v54 = vpack.c.b16 %v1211_v53, %v1210_v51 }
 0x83e   :  { %v1037_v42 = vadd.f32 %v3072_v19, %v2911_v4  ;;  %1334 = vrot.lane.b32.xlu0 %v3081_v54, %s2668_s11  ;;  %v1217_v3 = vsel %vm428_vm1, %v3081_v54, 0  ;;  %v2094_v4 = vld [vmem:[#allocation17 + $0x8] sm:$0xff] }
 0x83f   :  { %1226 = vmatpush.bf16.xpose.msra.mxu2 %v1217_v3  ;;  %1161 = vmatpush.bf16.msra.mxu0 %v2094_v4 }
 0x840   :  { %v1038_v43 = vpack.c.bf16 %v1037_v42, %v1036_v2 }
 0x842   :  { %2018 = vmatmul.msk.bf16.vlgmr.msrb.gmra.mxu2 %vm363_vm0, %v1038_v43 }
 0x843   :  { %1162 = vmatpush.bf16.msra.mxu0 %v2093_v60 }
 0x846   :  { %2037 = vmatmul.msk.bf16.vlgmr.msra.gmra.mxu0 %vm363_vm0, %v1127_v61 }
 0x856   :  { %2038 = vmatmul.msk.bf16.gmra.mxu0 %vm363_vm0, %v1128_v6 }
 0x8b0   :  { %v1335_v11 = vpop.permute.xlu0 %1334 }
 0x8b1   :  { %v1340_v56 = vsel %vm428_vm1, %v1335_v11, 0 }
 0x8b2   :  { %1349 = vmatpush.bf16.xpose.msrb.mxu0 %v1340_v56 }
 0x8c3   :  { %v1164_v13 = vpop.f32.mrf.mxu0 }
 0x8c4   :  { %v1165_v16 = vadd.f32 %v2136_v12, %v1164_v13 }
 0x8c5   :  { %v1071_v63 = vpop.f32.mrf.mxu2 }
 0x8c6   :  { %v1072_v0 = vadd.f32 %v2135_v62, %v1071_v63  ;;  %v1180_v17 = vpack.c.bf16 %v1165_v16, %v1165_v16 }
 0x8c8   :  { %v1174_v45 = vpack.c.bf16 %v1072_v0, %v1072_v0  ;;  %v1259_v55 = vunpack.c.l.b16 %v1180_v17 }
 0x8ca   :  { %v1304_v5 = vunpack.c.l.b16 %v1174_v45  ;;  %2039 = vmatmul.msk.bf16.vlgmr.msra.gmra.mxu1 %vm428_vm1, %v1174_v45 }
 0x8cb   :  { %v1166_v18 = vpop.f32.mrf.mxu0 }
 0x8cc   :  { %v3094_v7 = vpack.c.b16 %v1304_v5, %v1304_v5  ;;  %v1167_v20 = vadd.f32 %v2136_v12, %v1166_v18 }
 0x8cd   :  { %v1073_v8 = vpop.f32.mrf.mxu2 }
 0x8ce   :  { %v1074_v9 = vadd.f32 %v2135_v62, %v1073_v8  ;;  %1306 = vrot.lane.b32.xlu1 %v3094_v7, %s2668_s11  ;;  %v1181_v23 = vpack.c.bf16 %v1167_v20, %v1167_v20 }
 0x8d0   :  { %v1175_v39 = vpack.c.bf16 %v1074_v9, %v1074_v9  ;;  %v1260_v24 = vunpack.c.l.b16 %v1181_v23 }
 0x8d2   :  { %v1330_v1 = vunpack.c.l.b16 %v1175_v39  ;;  %2040 = vmatmul.msk.bf16.vlgmr.msra.gmra.mxu2 %vm428_vm1, %v1175_v39  ;;  %v3108_v25 = vpack.c.b16 %v1260_v24, %v1259_v55 }
 0x8d3   :  { %v1169_v26 = vpop.f32.mrf.mxu0 }
 0x8d4   :  { %v3100_v10 = vpack.c.b16 %v1330_v1, %v1330_v1  ;;  %1273 = vmatpush.bf16.msrb.mxu1 %v3108_v25  ;;  %v1170_v28 = vadd.f32 %v2136_v12, %v1169_v26 }
 0x8d6   :  { %1332 = vrot.lane.b32.xlu2 %v3100_v10, %s2668_s11  ;;  %v1182_v29 = vpack.c.bf16 %v1170_v28, %v1170_v28 }
 0x8d8   :  { %v1281_v34 = vunpack.c.l.b16 %v1182_v29 }
 0x8db   :  { %v1171_v32 = vpop.f32.mrf.mxu0 }
 0x8dc   :  { %v1172_v33 = vadd.f32 %v2136_v12, %v1171_v32 }
 0x8de   :  { %v1183_v35 = vpack.c.bf16 %v1172_v33, %v1172_v33 }
 0x8e0   :  { %v1282_v36 = vunpack.c.l.b16 %v1183_v35 }
 0x8e2   :  { %v3111_v37 = vpack.c.b16 %v1282_v36, %v1281_v34 }
 0x8e4   :  { %1295 = vmatpush.bf16.msrb.mxu2 %v3111_v37 }
 0x930   :  { %v1333_v57 = vpop.permute.xlu2 %1332 }
 0x931   :  { %2044 = vmatmul.msk.bf16.vlgmr.msrb.gmra.mxu0 %vm428_vm1, %v1333_v57 }
 0x940   :  { %v1307_v15 = vpop.permute.xlu1 %1306 }
 0x941   :  { %2043 = vmatmul.msk.bf16.vlgmr.msra.gmra.mxu3 %vm428_vm1, %v1307_v15 }
 0x947   :  { %v1204_v21 = vpop.f32.mrf.mxu1 }
 0x948   :  { %v1233_v22 = vsel %vm1232_vm9, %v1204_v21, -inf }
 0x949   :  { %1234 = vmax.xlane.f32.xlu2 %v1233_v22 }
 0x94f   :  { %v1206_v27 = vpop.f32.mrf.mxu1 }
 0x955   :  { %v1228_v30 = vpop.f32.mrf.mxu2 }
 0x956   :  { %v1236_v50 = vsel %vm1232_vm9, %v1228_v30, -inf }
 0x95d   :  { %v1230_v14 = vpop.f32.mrf.mxu2 }
 0x9ae   :  { %v1351_v38 = vpop.f32.mrf.mxu0 }
 0x9af   :  { %v1358_v51 = vsel %vm1232_vm9, %v1351_v38, -inf }
 0x9b6   :  { %v1353_v41 = vpop.f32.mrf.mxu0 }
 0x9bc   :  { %v1235_v2 = vpop.xlane.xlu2 %1234 }
 0x9bd   :  { %v1239_v42 = vsub.f32 %v1204_v21, %v1235_v2  ;;  %v1419_v21 = vld [vmem:[#allocation20 + $0x4] sm:$0xf] }
 0x9be   :  { %v1424_v22 = vsel %vm499_vm2, %v1419_v21, 0 }
 0x9bf   :  { %v1241_v43 = vmul.f32 1.442695, %v1239_v42  ;;  %1433 = vmatpush.bf16.msrb.mxu3 %v1424_v22 }
 0x9c1   :  { %2180 = vpow2.f32 %v1241_v43  ;;  %v1302_v43 = vld [vmem:[#allocation20] sm:$0xf] }
 0x9c4   :  { %v1325_v44 = vpop.f32.mrf.mxu3 }
 0x9c5   :  { %v1355_v46 = vsel %vm1232_vm9, %v1325_v44, -inf }
 0x9c6   :  { %1356 = vmax.xlane.f32.xlu0 %v1355_v46 }
 0x9c7   :  { %v2181_v47 = vpop.eup %2180 }
 0x9c8   :  { %v1245_v48 = vsel %vm1232_vm9, %v2181_v47, 0.0 }
 0x9c9   :  { %1246 = vadd.xlane.f32.xlu1 %v1245_v48 }
 0x9cc   :  { %v1327_v49 = vpop.f32.mrf.mxu3 }
 0x9d1   :  { %1237 = vmax.xlane.f32.xlu1 %v1236_v50 }
 0x9da   :  { %1379 = vrot.lane.b32.xlu0 %v3108_v25, %s2668_s11 }
 0x9ea   :  { %1460 = vrot.lane.b32.xlu1 %v3094_v7, %s2672_s15 }
 0xa04   :  { %1359 = vmax.xlane.f32.xlu0 %v1358_v51 }
 0xa18   :  { %1398 = vrot.lane.b32.xlu0 %v3111_v37, %s2668_s11 }
 0xa39   :  { %v1357_v52 = vpop.xlane.xlu0 %1356 }
 0xa3a   :  { %v1361_v53 = vsub.f32 %v1325_v44, %v1357_v52  ;;  %v1444_v44 = vsel %vm499_vm2, %v1302_v43, 0 }
 0xa3b   :  { %1453 = vmatpush.bf16.msra.mxu0 %v1444_v44 }
 0xa3c   :  { %v1363_v3 = vmul.f32 1.442695, %v1361_v53  ;;  %v1247_v4 = vpop.xlane.xlu1 %1246 }
 0xa3d   :  { %2182 = vrcp.f32 %v1247_v4 }
 0xa3e   :  { %2184 = vpow2.f32 %v1363_v3 }
 0xa43   :  { %v2183_v58 = vpop.eup %2182 }
 0xa44   :  { %v2185_v59 = vpop.eup %2184  ;;  %v1253_v60 = vmul.f32 %v2183_v58, %v2181_v47  ;;  %v1238_v0 = vpop.xlane.xlu1 %1237 }
 0xa45   :  { %v1367_v61 = vsel %vm1232_vm9, %v2185_v59, 0.0  ;;  %v1240_v45 = vsub.f32 %v1228_v30, %v1238_v0 }
 0xa46   :  { %v1255_v62 = vpack.c.bf16 %v1253_v60, %v1253_v60  ;;  %1368 = vadd.xlane.f32.xlu2 %v1367_v61 }
 0xa47   :  { %v1243_v8 = vmul.f32 1.442695, %v1240_v45 }
 0xa48   :  { %2041 = vmatmul.msk.bf16.vlgmr.msrb.gmra.mxu1 %vm1232_vm9, %v1255_v62 }
 0xa4c   :  { %v1380_v63 = vpop.permute.xlu0 %1379 }
 0xa4d   :  { %1392 = vmatpush.bf16.msra.mxu1 %v1380_v63 }
 0xa5e   :  { %1462 = vrot.lane.b32.xlu2 %v3060_v31, %s2672_s15 }
 0xa77   :  { %v1360_v5 = vpop.xlane.xlu0 %1359 }
 0xa78   :  { %v1362_v6 = vsub.f32 %v1351_v38, %v1360_v5 }
 0xa7a   :  { %v1365_v9 = vmul.f32 1.442695, %v1362_v6 }
 0xa7c   :  { %2186 = vpow2.f32 %v1365_v9 }
 0xa7d   :  { %2188 = vpow2.f32 %v1243_v8 }
 0xa82   :  { %v2187_v39 = vpop.eup %2186 }
 0xa83   :  { %v2189_v1 = vpop.eup %2188  ;;  %v1370_v11 = vsel %vm1232_vm9, %v2187_v39, 0.0 }
 0xa84   :  { %1371 = vadd.xlane.f32.xlu1 %v1370_v11  ;;  %v1248_v56 = vsel %vm1232_vm9, %v2189_v1, 0.0 }
 0xa87   :  { %1249 = vadd.xlane.f32.xlu2 %v1248_v56 }
 0xa9d   :  { %1483 = vrot.lane.b32.xlu1 %v3100_v10, %s2672_s15 }
 0xa9f   :  { %1485 = vrot.lane.b32.xlu2 %v3081_v54, %s2672_s15 }
 0xaa5   :  { %1530 = vrot.lane.b32.xlu1 %v3108_v25, %s2672_s15 }
 0xaad   :  { %1595 = vrot.lane.b32.xlu1 %v3060_v31, %s2674_s2  ;;  %v1461_v31 = vpop.permute.xlu1 %1460 }
 0xab5   :  { %1618 = vrot.lane.b32.xlu1 %v3081_v54, %s2674_s2  ;;  %v1399_v54 = vpop.permute.xlu0 %1398 }
 0xab6   :  { %1411 = vmatpush.bf16.msra.mxu2 %v1399_v54 }
 0xab9   :  { %v1369_v57 = vpop.xlane.xlu2 %1368 }
 0xaba   :  { %2190 = vrcp.f32 %v1369_v57 }
 0xabd   :  { %1616 = vrot.lane.b32.xlu1 %v3100_v10, %s2674_s2 }
 0xac0   :  { %v2191_v12 = vpop.eup %2190 }
 0xac1   :  { %v1375_v13 = vmul.f32 %v2191_v12, %v2185_v59  ;;  %v1463_v15 = vpop.permute.xlu2 %1462 }
 0xac2   :  { %v1468_v16 = vsel %vm428_vm1, %v1463_v15, 0 }
 0xac3   :  { %v1377_v17 = vpack.c.bf16 %v1375_v13, %v1375_v13  ;;  %1477 = vmatpush.bf16.xpose.msrb.mxu1 %v1468_v16 }
 0xac5   :  { %v1275_v18 = vpop.f32.mrf.mxu1  ;;  %2045 = vmatmul.msk.bf16.vlgmr.msra.gmra.mxu1 %vm1232_vm9, %v1377_v17 }
 0xacd   :  { %v1277_v20 = vpop.f32.mrf.mxu1 }
 0xad5   :  { %2049 = vmatmul.msk.bf16.vlgmr.msrb.gmra.mxu1 %vm428_vm1, %v1461_v31 }
 0xaf7   :  { %v1372_v26 = vpop.xlane.xlu1 %1371 }
 0xafa   :  { %v1250_v10 = vpop.xlane.xlu2 %1249 }
 0xafb   :  { %2192 = vrcp.f32 %v1250_v10 }
 0xafc   :  { %2194 = vrcp.f32 %v1372_v26 }
 0xb01   :  { %v2193_v55 = vpop.eup %2192 }
 0xb02   :  { %v1254_v23 = vmul.f32 %v2193_v55, %v2189_v1  ;;  %v1486_v24 = vpop.permute.xlu2 %1485  ;;  %v2195_v29 = vpop.eup %2194 }
 0xb03   :  { %v1491_v28 = vsel %vm428_vm1, %v1486_v24, 0  ;;  %v1376_v32 = vmul.f32 %v2195_v29, %v2187_v39 }
 0xb04   :  { %v1256_v27 = vpack.c.bf16 %v1254_v23, %v1254_v23 }
 0xb05   :  { %v1378_v33 = vpack.c.bf16 %v1376_v32, %v1376_v32 }
 0xb06   :  { %2042 = vmatmul.msk.bf16.vlgmr.msrb.gmra.mxu2 %vm1232_vm9, %v1256_v27 }
 0xb07   :  { %1500 = vmatpush.bf16.xpose.msrb.mxu2 %v1491_v28 }
 0xb0f   :  { %v1484_v30 = vpop.permute.xlu1 %1483 }
 0xb16   :  { %2046 = vmatmul.msk.bf16.vlgmr.msra.gmra.mxu2 %vm1232_vm9, %v1378_v33  ;;  %v1570_v33 = vld [vmem:[#allocation20 + $0x8] sm:$0xf] }
 0xb17   :  { %v1531_v34 = vpop.permute.xlu1 %1530 }
 0xb18   :  { %1543 = vmatpush.bf16.msra.mxu3 %v1531_v34  ;;  %v1575_v34 = vsel %vm499_vm2, %v1570_v33, 0 }
 0xb19   :  { %1584 = vmatpush.bf16.msra.mxu1 %v1575_v34 }
 0xb1f   :  { %v1596_v35 = vpop.permute.xlu1 %1595 }
 0xb20   :  { %v1601_v36 = vsel %vm428_vm1, %v1596_v35, 0 }
 0xb21   :  { %1610 = vmatpush.bf16.xpose.msra.mxu2 %v1601_v36 }
 0xb26   :  { %2050 = vmatmul.msk.bf16.vlgmr.msrb.gmra.mxu2 %vm428_vm1, %v1484_v30 }
 0xb27   :  { %v1619_v49 = vpop.permute.xlu1 %1618 }
 0xb28   :  { %v1624_v52 = vsel %vm428_vm1, %v1619_v49, 0 }
 0xb2f   :  { %v1617_v17 = vpop.permute.xlu1 %1616 }
 0xb42   :  { %v1394_v14 = vpop.f32.mrf.mxu1 }
 0xb4a   :  { %v1396_v38 = vpop.f32.mrf.mxu1 }
 0xb52   :  { %v1479_v41 = vpop.f32.mrf.mxu1 }
 0xb53   :  { %v1506_v2 = vsel %vm1232_vm9, %v1479_v41, -inf }
 0xb54   :  { %1507 = vmax.xlane.f32.xlu0 %v1506_v2 }
 0xb5a   :  { %v1481_v42 = vpop.f32.mrf.mxu1 }
 0xb68   :  { %1593 = vrot.lane.b32.xlu0 %v3094_v7, %s2674_s2 }
 0xb89   :  { %v1297_v46 = vpop.f32.mrf.mxu2 }
 0xb8a   :  { %v1301_v47 = vpack.c.bf16 %v1297_v46, %v1275_v18 }
 0xb8c   :  { %2048 = vmatmul.msk.bf16.vlgmr.msra.gmra.mxu0 %vm428_vm1, %v1301_v47 }
 0xb91   :  { %v1299_v48 = vpop.f32.mrf.mxu2 }
 0xb99   :  { %v1413_v50 = vpop.f32.mrf.mxu2 }
 0xb9a   :  { %v1417_v51 = vpack.c.bf16 %v1413_v50, %v1394_v14 }
 0xb9c   :  { %2047 = vmatmul.msk.bf16.vlgmr.msrb.gmra.mxu3 %vm428_vm1, %v1417_v51 }
 0xb9d   :  { %1633 = vmatpush.bf16.xpose.msrb.mxu3 %v1624_v52 }
 0xba1   :  { %v1415_v53 = vpop.f32.mrf.mxu2 }
 0xba9   :  { %v1502_v3 = vpop.f32.mrf.mxu2 }
 0xbaa   :  { %v1509_v63 = vsel %vm1232_vm9, %v1502_v3, -inf }
 0xbb1   :  { %v1504_v7 = vpop.f32.mrf.mxu2 }
 0xbc7   :  { %v1508_v4 = vpop.xlane.xlu0 %1507 }
 0xbc8   :  { %v1512_v58 = vsub.f32 %v1479_v41, %v1508_v4 }
 0xbca   :  { %v1514_v59 = vmul.f32 1.442695, %v1512_v58 }
 0xbcc   :  { %2196 = vpow2.f32 %v1514_v59 }
 0xbd2   :  { %v2197_v60 = vpop.eup %2196 }
 0xbd3   :  { %v1518_v61 = vsel %vm1232_vm9, %v2197_v60, 0.0 }
 0xbd4   :  { %1519 = vadd.xlane.f32.xlu2 %v1518_v61 }
 0xbda   :  { %v1594_v62 = vpop.permute.xlu0 %1593 }
 0xbdb   :  { %2054 = vmatmul.msk.bf16.vlgmr.msra.gmra.mxu2 %vm428_vm1, %v1594_v62 }
 0xbdc   :  { %1510 = vmax.xlane.f32.xlu2 %v1509_v63 }
 0xbf4   :  { %1549 = vrot.lane.b32.xlu2 %v3111_v37, %s2672_s15 }
 0xc09   :  { %v1455_v0 = vpop.f32.mrf.mxu0 }
 0xc11   :  { %v1457_v35 = vpop.f32.mrf.mxu0 }
 0xc1f   :  { %v1435_v45 = vpop.f32.mrf.mxu3 }
 0xc20   :  { %v3163_v5 = vadd.f32 %v1455_v0, %v1435_v45  ;;  %v2137_v45 = vld [vmem:[#allocation22] ss:$0 sm:$0xff] }
 0xc27   :  { %v3169_v20 = vpop.f32.mrf.mxu3 }
 0xc47   :  { %v1520_v6 = vpop.xlane.xlu2 %1519 }
 0xc48   :  { %2198 = vrcp.f32 %v1520_v6 }
 0xc4e   :  { %v2199_v8 = vpop.eup %2198 }
 0xc4f   :  { %v1526_v9 = vmul.f32 %v2199_v8, %v2197_v60  ;;  %v1511_v39 = vpop.xlane.xlu2 %1510  ;;  %v1703_v60 = vld [vmem:[#allocation20 + $0xc] sm:$0xf] }
 0xc50   :  { %v1513_v1 = vsub.f32 %v1502_v3, %v1511_v39  ;;  %v1708_v61 = vsel %vm499_vm2, %v1703_v60, 0 }
 0xc51   :  { %v1528_v11 = vpack.c.bf16 %v1526_v9, %v1526_v9  ;;  %1717 = vmatpush.bf16.msrb.mxu2 %v1708_v61  ;;  %v1458_v9 = vadd.f32 %v1457_v35, %v3169_v20  ;;  %v2140_v61 = vld [vmem:[#allocation25] ss:$0 sm:$0xff] }
 0xc52   :  { %v1516_v56 = vmul.f32 1.442695, %v1513_v1 }
 0xc53   :  { %2051 = vmatmul.msk.bf16.vlgmr.msra.gmra.mxu3 %vm1232_vm9, %v1528_v11 }
 0xc54   :  { %2200 = vpow2.f32 %v1516_v56 }
 0xc57   :  { %v1550_v57 = vpop.permute.xlu2 %1549 }
 0xc58   :  { %1562 = vmatpush.bf16.msrb.mxu0 %v1550_v57 }
 0xc5a   :  { %v2201_v12 = vpop.eup %2200 }
 0xc5b   :  { %v1521_v13 = vsel %vm1232_vm9, %v2201_v12, 0.0 }
 0xc5c   :  { %1522 = vadd.xlane.f32.xlu1 %v1521_v13 }
 0xc5e   :  { %v1612_v15 = vpop.f32.mrf.mxu2 }
 0xc5f   :  { %v1639_v16 = vsel %vm1232_vm9, %v1612_v15, -inf }
 0xc60   :  { %1640 = vmax.xlane.f32.xlu0 %v1639_v16 }
 0xc63   :  { %2055 = vmatmul.msk.bf16.vlgmr.msrb.gmra.mxu3 %vm428_vm1, %v1617_v17 }
 0xc66   :  { %v1614_v18 = vpop.f32.mrf.mxu2 }
 0xccf   :  { %v1523_v31 = vpop.xlane.xlu1 %1522 }
 0xcd0   :  { %2202 = vrcp.f32 %v1523_v31 }
 0xcd3   :  { %v1641_v54 = vpop.xlane.xlu0 %1640 }
 0xcd4   :  { %v1645_v21 = vsub.f32 %v1612_v15, %v1641_v54 }
 0xcd6   :  { %v2203_v22 = vpop.eup %2202  ;;  %v1647_v10 = vmul.f32 1.442695, %v1645_v21  ;;  %v1545_v55 = vpop.f32.mrf.mxu3 }
 0xcd7   :  { %v1527_v23 = vmul.f32 %v2203_v22, %v2201_v12 }
 0xcd8   :  { %2204 = vpow2.f32 %v1647_v10 }
 0xcd9   :  { %v1529_v24 = vpack.c.bf16 %v1527_v23, %v1527_v23 }
 0xcdb   :  { %2052 = vmatmul.msk.bf16.vlgmr.msrb.gmra.mxu0 %vm1232_vm9, %v1529_v24 }
 0xcde   :  { %v2205_v26 = vpop.eup %2204  ;;  %v1547_v27 = vpop.f32.mrf.mxu3 }
 0xcdf   :  { %v1651_v28 = vsel %vm1232_vm9, %v2205_v26, 0.0 }
 0xce0   :  { %1652 = vadd.xlane.f32.xlu1 %v1651_v28 }
 0xce6   :  { %v1635_v29 = vpop.f32.mrf.mxu3 }
 0xce7   :  { %v1642_v30 = vsel %vm1232_vm9, %v1635_v29, -inf }
 0xce8   :  { %1643 = vmax.xlane.f32.xlu2 %v1642_v30 }
 0xcee   :  { %v1637_v32 = vpop.f32.mrf.mxu3 }
 0xcf9   :  { %1663 = vrot.lane.b32.xlu1 %v3108_v25, %s2674_s2 }
 0xd53   :  { %v1653_v41 = vpop.xlane.xlu1 %1652 }
 0xd54   :  { %2206 = vrcp.f32 %v1653_v41 }
 0xd58   :  { %v1564_v36 = vpop.f32.mrf.mxu0 }
 0xd59   :  { %v1568_v14 = vpack.c.bf16 %v1564_v36, %v1545_v55  ;;  %v2096_v55 = vld [vmem:[#allocation23 + $0x8] sm:$0xff] }
 0xd5a   :  { %v2207_v44 = vpop.eup %2206  ;;  %1820 = vmatpush.bf16.msra.mxu3 %v2096_v55 }
 0xd5b   :  { %2053 = vmatmul.msk.bf16.vlgmr.msra.gmra.mxu1 %vm428_vm1, %v1568_v14  ;;  %v1644_v38 = vpop.xlane.xlu2 %1643  ;;  %v1659_v47 = vmul.f32 %v2207_v44, %v2205_v26  ;;  %v2095_v26 = vld [vmem:[#allocation23] sm:$0xff]  ;;  %v2138_v44 = vld [vmem:[%s3254_s24] ss:$0 sm:$0xff] }
 0xd5c   :  { %v1646_v2 = vsub.f32 %v1635_v29, %v1644_v38 }
 0xd5d   :  { %v1661_v49 = vpack.c.bf16 %v1659_v47, %v1659_v47 }
 0xd5e   :  { %v1649_v42 = vmul.f32 1.442695, %v1646_v2  ;;  %1821 = vmatpush.bf16.msra.mxu3 %v2095_v26 }
 0xd60   :  { %2208 = vpow2.f32 %v1649_v42  ;;  %v1566_v43 = vpop.f32.mrf.mxu0 }
 0xd66   :  { %v2209_v46 = vpop.eup %2208 }
 0xd67   :  { %v1654_v25 = vsel %vm1232_vm9, %v2209_v46, 0.0 }
 0xd68   :  { %1655 = vadd.xlane.f32.xlu0 %v1654_v25 }
 0xd6b   :  { %v1664_v48 = vpop.permute.xlu1 %1663 }
 0xd6c   :  { %1676 = vmatpush.bf16.msra.mxu0 %v1664_v48  ;;  %v2139_v48 = vld [vmem:[%s3255_s25] ss:$0 sm:$0xff] }
 0xd6f   :  { %2056 = vmatmul.msk.bf16.vlgmr.msra.gmra.mxu0 %vm1232_vm9, %v1661_v49 }
 0xd7c   :  { %1682 = vrot.lane.b32.xlu0 %v3111_v37, %s2674_s2 }
 0xdd8   :  { %v1586_v50 = vpop.f32.mrf.mxu1 }
 0xdd9   :  { %v1591_v51 = vadd.f32 %v1586_v50, %v3163_v5 }
 0xddb   :  { %v1656_v52 = vpop.xlane.xlu0 %1655 }
 0xddc   :  { %2210 = vrcp.f32 %v1656_v52 }
 0xde0   :  { %v1588_v62 = vpop.f32.mrf.mxu1 }
 0xde1   :  { %v1592_v1 = vadd.f32 %v1588_v62, %v1458_v9 }
 0xde2   :  { %v2211_v53 = vpop.eup %2210 }
 0xde3   :  { %v1660_v3 = vmul.f32 %v2211_v53, %v2209_v46 }
 0xde5   :  { %v1662_v58 = vpack.c.bf16 %v1660_v3, %v1660_v3 }
 0xdec   :  { %v1678_v7 = vpop.f32.mrf.mxu0 }
 0xdee   :  { %v1683_v4 = vpop.permute.xlu0 %1682 }
 0xdef   :  { %1695 = vmatpush.bf16.msrb.mxu1 %v1683_v4  ;;  %v2099_v4 = vld [vmem:[%s3250_s20 + $0x10] sm:$0xff] }
 0xdf2   :  { %2057 = vmatmul.msk.bf16.vlgmr.msrb.gmra.mxu1 %vm1232_vm9, %v1662_v58  ;;  %v2098_v58 = vld [vmem:[%s3250_s20 + $0x8] sm:$0xff] }
 0xdf4   :  { %v1680_v59 = vpop.f32.mrf.mxu0 }
 0xdf5   :  { %v2097_v59 = vld [vmem:[%s3250_s20] sm:$0xff] }
 0xe6f   :  { %v1697_v37 = vpop.f32.mrf.mxu1 }
 0xe70   :  { %v1701_v63 = vpack.c.bf16 %v1697_v37, %v1678_v7  ;;  %v2100_v7 = vld [vmem:[%s3250_s20 + $0x18] sm:$0xff] }
 0xe71   :  { %1875 = vmatpush.bf16.msrb.mxu0 %v2100_v7 }
 0xe72   :  { %2058 = vmatmul.msk.bf16.vlgmr.msrb.gmra.mxu2 %vm428_vm1, %v1701_v63  ;;  %vm1867_vm1 = vcmask 523264  }
 0xe75   :  { %1876 = vmatpush.bf16.msrb.mxu0 %v2099_v4 }
 0xe77   :  { %v1699_v0 = vpop.f32.mrf.mxu1 }
 0xe79   :  { %1877 = vmatpush.bf16.msrb.mxu0 %v2098_v58 }
 0xe7d   :  { %1878 = vmatpush.bf16.msrb.mxu0 %v2097_v59 }
 0xef5   :  { %v1719_v5 = vpop.f32.mrf.mxu2 }
 0xef6   :  { %v1724_v6 = vadd.f32 %v1719_v5, %v1591_v51 }
 0xef8   :  { %v1730_v8 = vadd.f32 %v2137_v45, %v1724_v6  ;;  %v2141_v6 = vld [vmem:[%s3251_s21] ss:$0 sm:$0xff] }
 0xefa   :  { %v1732_v39 = vadd.f32 %v1730_v8, %v3070_v40 }
 0xefc   :  { %v1734_v11 = vsel %vm363_vm0, %v1732_v39, 0.0 }
 0xefd   :  { %1735 = vadd.xlane.f32.xlu2 %v1734_v11  ;;  %v1721_v56 = vpop.f32.mrf.mxu2 }
 0xefe   :  { %v1725_v57 = vadd.f32 %v1721_v56, %v1592_v1 }
 0xf00   :  { %v1731_v12 = vadd.f32 %v2137_v45, %v1725_v57 }
 0xf02   :  { %v1733_v13 = vadd.f32 %v1731_v12, %v3072_v19 }
 0xf04   :  { %v1737_v15 = vsel %vm363_vm0, %v1733_v13, 0.0 }
 0xf05   :  { %1738 = vadd.xlane.f32.xlu1 %v1737_v15 }
 0xf70   :  { %v1736_v16 = vpop.xlane.xlu2 %1735 }
 0xf71   :  { %v1740_v17 = vmul.f32 0.03125, %v1736_v16 }
 0xf73   :  { %v1742_v18 = vsub.f32 %v1732_v39, %v1740_v17 }
 0xf75   :  { %v1744_v31 = vmul.f32 %v1742_v18, %v1742_v18 }
 0xf77   :  { %v1746_v20 = vsel %vm363_vm0, %v1744_v31, 0.0 }
 0xf78   :  { %1747 = vadd.xlane.f32.xlu2 %v1746_v20  ;;  %v1739_v40 = vpop.xlane.xlu1 %1738 }
 0xf79   :  { %v1741_v54 = vmul.f32 0.03125, %v1739_v40 }
 0xf7b   :  { %v1743_v21 = vsub.f32 %v1733_v13, %v1741_v54 }
 0xf7d   :  { %v1745_v22 = vmul.f32 %v1743_v21, %v1743_v21 }
 0xf7f   :  { %v1749_v10 = vsel %vm363_vm0, %v1745_v22, 0.0 }
 0xf80   :  { %1750 = vadd.xlane.f32.xlu0 %v1749_v10 }
 0xfeb   :  { %v1748_v23 = vpop.xlane.xlu2 %1747 }
 0xfec   :  { %v1752_v19 = vmul.f32 0.03125, %v1748_v23 }
 0xfee   :  { %v1754_v24 = vadd.f32 1e-05, %v1752_v19 }
 0xff0   :  { %2212 = vrsqrt.f32 %v1754_v24  ;;  %vm1762_vm11 = vweird.f32 %v1754_v24 }
 0xff3   :  { %v1751_v27 = vpop.xlane.xlu0 %1750 }
 0xff4   :  { %v1753_v28 = vmul.f32 0.03125, %v1751_v27 }
 0xff6   :  { %v2213_v29 = vpop.eup %2212  ;;  %v1755_v30 = vadd.f32 1e-05, %v1753_v28 }
 0xff7   :  { %v1757_v32 = vmul.f32 %v2213_v29, %v1754_v24  ;;  %vm1763_vm10 = vweird.f32 %v2213_v29 }
 0xff8   :  { %2214 = vrsqrt.f32 %v1755_v30  ;;  %vm1764_vm12 = vmor %vm1762_vm11, %vm1763_vm10  ;;  %vm1772_vm14 = vweird.f32 %v1755_v30 }
 0xff9   :  { %v1758_v33 = vmul.f32 %v2213_v29, %v1757_v32 }
 0xffb   :  { %v1759_v34 = vmul.f32 0.5, %v1758_v33 }
 0xffd   :  { %v1760_v35 = vsub.f32 1.5, %v1759_v34 }
 0xffe   :  { %v2215_v36 = vpop.eup %2214 }
 0xfff   :  { %v1761_v14 = vmul.f32 %v2213_v29, %v1760_v35  ;;  %v1767_v38 = vmul.f32 %v2215_v36, %v1755_v30  ;;  %vm1773_vm13 = vweird.f32 %v2215_v36  ;;  %v2142_v35 = vld [vmem:[#allocation26] ss:$0 sm:$0xff] }
0x1000   :  { %vm1774_vm15 = vmor %vm1772_vm14, %vm1773_vm13 }
0x1001   :  { %v1768_v41 = vmul.f32 %v2215_v36, %v1767_v38  ;;  %v1765_v2 = vsel %vm1764_vm12, %v2213_v29, %v1761_v14 }
0x1002   :  { %v1776_v46 = vmul.f32 %v1765_v2, %v1742_v18 }
0x1003   :  { %v1769_v42 = vmul.f32 0.5, %v1768_v41  ;;  %v2143_v41 = vld [vmem:[%s3257_s27] ss:$0 sm:$0xff] }
0x1004   :  { %v1782_v49 = vmul.f32 %v2138_v44, %v1776_v46 }
0x1005   :  { %v1770_v43 = vsub.f32 1.5, %v1769_v42 }
0x1006   :  { %v1788_v52 = vadd.f32 %v2139_v48, %v1782_v49 }
0x1007   :  { %v1771_v25 = vmul.f32 %v2215_v36, %v1770_v43 }
0x1009   :  { %v1775_v47 = vsel %vm1774_vm15, %v2215_v36, %v1771_v25 }
0x100a   :  { %v1777_v50 = vmul.f32 %v1775_v47, %v1743_v21 }
0x100c   :  { %v1783_v51 = vmul.f32 %v2138_v44, %v1777_v50 }
0x100e   :  { %v1789_v53 = vadd.f32 %v2139_v48, %v1783_v51 }
0x1010   :  { %v1790_v3 = vpack.c.bf16 %v1789_v53, %v1788_v52 }
0x1012   :  { %2067 = vmatmul.msk.bf16.vlgmr.msra.gmra.mxu3 %vm363_vm0, %v1790_v3 }
0x1095   :  { %v1823_v60 = vpop.f32.mrf.mxu3 }
0x1096   :  { %v1824_v62 = vadd.f32 %v2140_v61, %v1823_v60 }
0x1098   :  { %v1828_v0 = vmax.f32 %v1824_v62, 0.0 }
0x109d   :  { %v1825_v37 = vpop.f32.mrf.mxu3 }
0x109e   :  { %v1826_v63 = vadd.f32 %v2140_v61, %v1825_v37 }
0x10a0   :  { %v1829_v45 = vmax.f32 %v1826_v63, 0.0 }
0x10a2   :  { %v1830_v5 = vpack.c.bf16 %v1829_v45, %v1828_v0 }
0x10a4   :  { %2084 = vmatmul.msk.bf16.vlgmr.msrb.gmra.mxu0 %vm1867_vm1, %v1830_v5 }
0x1121   :  { %v1880_v8 = vpop.f32.mrf.mxu0 }
0x1122   :  { %v1881_v9 = vadd.f32 %v2141_v6, %v1880_v8 }
0x1124   :  { %v1885_v39 = vadd.f32 %v1881_v9, %v1788_v52 }
0x1126   :  { %v1887_v1 = vsel %vm363_vm0, %v1885_v39, 0.0 }
0x1127   :  { %1888 = vadd.xlane.f32.xlu2 %v1887_v1 }
0x1129   :  { %v1882_v11 = vpop.f32.mrf.mxu0 }
0x112a   :  { %v1883_v56 = vadd.f32 %v2141_v6, %v1882_v11 }
0x112c   :  { %v1886_v57 = vadd.f32 %v1883_v56, %v1789_v53 }
0x112e   :  { %v1890_v12 = vsel %vm363_vm0, %v1886_v57, 0.0 }
0x112f   :  { %1891 = vadd.xlane.f32.xlu2 %v1890_v12 }
0x119a   :  { %v1889_v13 = vpop.xlane.xlu2 %1888 }
0x119b   :  { %v1893_v15 = vmul.f32 0.03125, %v1889_v13 }
0x119d   :  { %v1895_v16 = vsub.f32 %v1885_v39, %v1893_v15 }
0x119f   :  { %v1897_v17 = vmul.f32 %v1895_v16, %v1895_v16 }
0x11a1   :  { %v1899_v18 = vsel %vm363_vm0, %v1897_v17, 0.0 }
0x11a2   :  { %1900 = vadd.xlane.f32.xlu2 %v1899_v18  ;;  %v1892_v31 = vpop.xlane.xlu2 %1891 }
0x11a3   :  { %v1894_v20 = vmul.f32 0.03125, %v1892_v31 }
0x11a5   :  { %v1896_v40 = vsub.f32 %v1886_v57, %v1894_v20 }
0x11a7   :  { %v1898_v54 = vmul.f32 %v1896_v40, %v1896_v40 }
0x11a9   :  { %v1902_v21 = vsel %vm363_vm0, %v1898_v54, 0.0 }
0x11aa   :  { %1903 = vadd.xlane.f32.xlu2 %v1902_v21 }
0x1215   :  { %v1901_v22 = vpop.xlane.xlu2 %1900 }
0x1216   :  { %v1905_v10 = vmul.f32 0.03125, %v1901_v22 }
0x1218   :  { %v1907_v55 = vadd.f32 1e-05, %v1905_v10 }
0x121a   :  { %2216 = vrsqrt.f32 %v1907_v55  ;;  %vm1915_vm3 = vweird.f32 %v1907_v55 }
0x121d   :  { %v1904_v23 = vpop.xlane.xlu2 %1903 }
0x121e   :  { %v1906_v19 = vmul.f32 0.03125, %v1904_v23 }
0x1220   :  { %v2217_v24 = vpop.eup %2216  ;;  %v1908_v26 = vadd.f32 1e-05, %v1906_v19 }
0x1221   :  { %v1910_v27 = vmul.f32 %v2217_v24, %v1907_v55  ;;  %vm1916_vm2 = vweird.f32 %v2217_v24 }
0x1222   :  { %2218 = vrsqrt.f32 %v1908_v26  ;;  %vm1917_vm4 = vmor %vm1915_vm3, %vm1916_vm2  ;;  %vm1925_vm6 = vweird.f32 %v1908_v26 }
0x1223   :  { %v1911_v28 = vmul.f32 %v2217_v24, %v1910_v27 }
0x1225   :  { %v1912_v29 = vmul.f32 0.5, %v1911_v28 }
0x1227   :  { %v1913_v30 = vsub.f32 1.5, %v1912_v29 }
0x1228   :  { %v2219_v32 = vpop.eup %2218 }
0x1229   :  { %v1914_v33 = vmul.f32 %v2217_v24, %v1913_v30  ;;  %v1920_v34 = vmul.f32 %v2219_v32, %v1908_v26  ;;  %vm1926_vm5 = vweird.f32 %v2219_v32 }
0x122a   :  { %vm1927_vm7 = vmor %vm1925_vm6, %vm1926_vm5 }
0x122b   :  { %v1918_v36 = vsel %vm1917_vm4, %v2217_v24, %v1914_v33  ;;  %v1921_v14 = vmul.f32 %v2219_v32, %v1920_v34 }
0x122c   :  { %v1929_v38 = vmul.f32 %v1918_v36, %v1895_v16 }
0x122d   :  { %v1922_v2 = vmul.f32 0.5, %v1921_v14 }
0x122e   :  { %v1935_v42 = vmul.f32 %v2142_v35, %v1929_v38 }
0x122f   :  { %v1923_v43 = vsub.f32 1.5, %v1922_v2 }
0x1230   :  { %v1941_v44 = vadd.f32 %v2143_v41, %v1935_v42 }
0x1231   :  { %v1924_v46 = vmul.f32 %v2219_v32, %v1923_v43 }
0x1232   :  { %1943 = vst.msk [vmem:[#allocation28] sm:$0xff] %vm363_vm0, %v1941_v44 }
0x1233   :  { %v1928_v25 = vsel %vm1927_vm7, %v2219_v32, %v1924_v46 }
0x1234   :  { %v1930_v47 = vmul.f32 %v1928_v25, %v1896_v40 }
0x1236   :  { %v1936_v48 = vmul.f32 %v2142_v35, %v1930_v47 }
0x1238   :  { %v1942_v49 = vadd.f32 %v2143_v41, %v1936_v48 }
0x123a   :  { %1944 = vst.msk [vmem:[#allocation28 + $0x8] sm:$0xff] %vm363_vm0, %v1942_v49 }
0x123b   :  { %1957 = dma.vmem_to_hbm [thread:$0]  %s1950_s26, 256, %s1952_s7, [#allocation4], %s3286_s14, %s3286_s14, %s3285_s1  }
0x123c   :  { %2646 = dma.done.wait [#allocation4], 256  }
0x123d   :  { %2647 = vsyncadd [#allocation4], 4294967040 }
0x123e   :  { %1962 = vsyncpa [#allocation3], 1 }
0x123f   :  { %1963 = vsyncpa [#allocation6], 1 }
0x1240   :  { %1964 = vsyncpa [#allocation9], 1 }
0x1241   :  { %1965 = vsyncpa [#allocation12], 1 }
0x1242   :  { %1966 = vsyncpa [#allocation15], 1 }
0x1243   :  { %1967 = vsyncpa [#allocation18], 1 }
0x1244   :  { %1968 = vsyncpa [#allocation21], 1 }
0x1245   :  { %1969 = vsyncpa [#allocation24], 1 }
0x1246   :  { %1970 = vsyncpa [#allocation27], 1 }
0x1247   :  { %1971 = vsyncpa [#allocation4], 1 }

</bundles_post_ra>
